<compile_context>
chip_gen: v7x
topology: tpu7x:2x2x1
jax: 0.10.0
libtpu: 0.0.40
codegen_flags: <defaults>
</compile_context>

<pallas_src>
import functools

import jax
import jax.numpy as jnp
from jax import lax
from jax.experimental import pallas as pl
from jax.experimental.pallas import tpu as pltpu


# ----------------------------------------------------------------------------
# Model hyper-parameters (small, shape-consistent with a GPT-2 style model)
# ----------------------------------------------------------------------------
VOCAB = 64       # vocab size (gpt2-medium uses 50257; small here)
D = 32           # hidden size (gpt2-medium uses 1024)
N_HEAD = 4
HEAD_DIM = D // N_HEAD
N_LAYER = 2      # gpt2-medium uses 24
MAX_POS = 16
EPS = 1e-5

B = 2            # batch
S = 8            # sequence length

VMEM_LIMIT = 32 * 1024 * 1024   # explicit (v5e scoped default is 16 MiB)


# ----------------------------------------------------------------------------
# In-kernel helpers
# ----------------------------------------------------------------------------
def _gelu_new(x):
    # GPT-2 "gelu_new": tanh approximation (tanh goes to the EUP slot)
    c = jnp.float32(0.7978845608028654)  # sqrt(2/pi)
    return 0.5 * x * (1.0 + jnp.tanh(c * (x + 0.044715 * x * x * x)))


def _layer_norm(x, g, b):
    mu = jnp.mean(x, axis=-1, keepdims=True)
    xc = x - mu
    var = jnp.mean(xc * xc, axis=-1, keepdims=True)
    return xc * lax.rsqrt(var + EPS) * g + b


_TRANS_B = (((1,), (1,)), ((), ()))   # contract dim 1 of both operands (A @ B.T)


# ----------------------------------------------------------------------------
# Pallas kernels
# ----------------------------------------------------------------------------
def _block_kernel(h_in_ref, mask_ref,
                  ln1_g_ref, ln1_b_ref, w_qkv_ref, b_qkv_ref,
                  w_proj_ref, b_proj_ref,
                  ln2_g_ref, ln2_b_ref, w_fc_ref, b_fc_ref,
                  w_mproj_ref, b_mproj_ref,
                  h_ref, hs_ref,
                  *, n_head, head_dim):
    """One transformer block for one batch shard per grid step.

    grid = (batch, n_layer); the residual stream for batch b lives in h_ref
    (same output block for every layer step of that batch).
    """
    layer = pl.program_id(1)
    d = n_head * head_dim

    @pl.when(layer == 0)
    def _():
        h_ref[...] = h_in_ref[...]            # load embeddings into the residual

    h = h_ref[...].astype(jnp.float32)        # (S, D) f32

    def mm(x_bf16, w_ref, b_ref, act=None):
        acc = jnp.dot(x_bf16, w_ref[0], preferred_element_type=jnp.float32)
        acc = acc + b_ref[0].astype(jnp.float32)
        if act == "gelu":
            acc = _gelu_new(acc)
        return acc

    # ---------------- attention block ----------------
    x = _layer_norm(h, ln1_g_ref[0].astype(jnp.float32),
                    ln1_b_ref[0].astype(jnp.float32))
    qkv = mm(x.astype(jnp.bfloat16), w_qkv_ref, b_qkv_ref)     # (S, 3D) f32
    qkv_bf = qkv.astype(jnp.bfloat16)                          # cast ONCE, slice bf16 slab

    mask = mask_ref[...]                                       # (S, S) additive, resident
    scale = jnp.float32(1.0 / float(head_dim) ** 0.5)
    w_proj_bf = w_proj_ref[0]                                  # (D, D) bf16

    attn_acc = jnp.zeros((h.shape[0], d), jnp.float32)
    # TODO(synk): replace with one heads-batched dot_general at real sizes.
    for hd_i in range(n_head):                                 # unrolled, in-VMEM
        lo = hd_i * head_dim
        q_h = qkv_bf[:, lo:lo + head_dim]                      # (S, hd) bf16
        k_h = qkv_bf[:, d + lo:d + lo + head_dim]
        v_h = qkv_bf[:, 2 * d + lo:2 * d + lo + head_dim]
        s = lax.dot_general(q_h, k_h, _TRANS_B,
                            preferred_element_type=jnp.float32)  # (S, S) f32
        s = s * scale + mask
        s = s - jnp.max(s, axis=-1, keepdims=True)
        p = jnp.exp(s)
        p = p * pl.reciprocal(jnp.sum(p, axis=-1, keepdims=True), approx=True)
        ctx = jnp.dot(p.astype(jnp.bfloat16), v_h,
                      preferred_element_type=jnp.float32)        # (S, hd) f32
        # fold the head-merge into w_proj: accumulate PV through the matching
        # row-slice of w_proj (no concat / lane-relayout, output stays (S, D)).
        attn_acc = attn_acc + jnp.dot(ctx.astype(jnp.bfloat16),
                                      w_proj_bf[lo:lo + head_dim, :],
                                      preferred_element_type=jnp.float32)
    h = h + attn_acc + b_proj_ref[0].astype(jnp.float32)

    # ---------------- MLP block ----------------
    x = _layer_norm(h, ln2_g_ref[0].astype(jnp.float32),
                    ln2_b_ref[0].astype(jnp.float32))
    ff = mm(x.astype(jnp.bfloat16), w_fc_ref, b_fc_ref, act="gelu")
    h = h + mm(ff.astype(jnp.bfloat16), w_mproj_ref, b_mproj_ref)

    h_ref[...] = h.astype(h_ref.dtype)        # carried residual (f32, VMEM-resident)
    hs_ref[0] = h.astype(hs_ref.dtype)        # per-layer hidden state (bf16 writeback)


def _head_kernel(h_ref, g_ref, b_ref, wte_ref, logits_ref, hout_ref):
    """Final LayerNorm + tied LM head, tiled over the (padded) vocab axis.

    logits_tile = ln_f(h) @ wte_tile.T (no bias, no wte.T materialization).
    The LN output is recomputed/written per vocab tile (idempotent, so it is
    safe under "parallel" megacore sharding of the vocab axis).
    """
    h = h_ref[...].astype(jnp.float32)
    x = _layer_norm(h, g_ref[...].astype(jnp.float32),
                    b_ref[...].astype(jnp.float32))
    hout_ref[...] = x.astype(hout_ref.dtype)
    logits = lax.dot_general(x.astype(jnp.bfloat16), wte_ref[...],
                             _TRANS_B, preferred_element_type=jnp.float32)
    logits_ref[...] = logits.astype(logits_ref.dtype)


# ----------------------------------------------------------------------------
# Pallas wrappers
# ----------------------------------------------------------------------------
_BLK_ARG_ORDER = ("ln1_g", "ln1_b", "w_qkv", "b_qkv", "w_proj", "b_proj",
                  "ln2_g", "ln2_b", "w_fc", "b_fc", "w_mproj", "b_mproj")


def transformer_stack(h0, mask, blk, *, batch, seq):
    """All N_LAYER transformer blocks in a single pallas_call, grid=(B, L)."""
    m, d = h0.shape
    n_layer = blk["ln1_g"].shape[0]

    in_specs = [
        pl.BlockSpec((seq, d), lambda b, l: (b, 0)),       # per-batch residual input
        pl.BlockSpec((seq, seq), lambda b, l: (0, 0)),     # causal mask, resident
    ]
    args = [h0, mask]
    for name in _BLK_ARG_ORDER:                            # per-layer stacked weights
        a = blk[name]
        in_specs.append(pl.BlockSpec((1, a.shape[1], a.shape[2]),
                                     lambda b, l: (l, 0, 0)))
        args.append(a)

    kernel = functools.partial(_block_kernel, n_head=N_HEAD, head_dim=HEAD_DIM)

    h_last, hs = pl.pallas_call(
        kernel,
        out_shape=(jax.ShapeDtypeStruct((m, d), jnp.float32),
                   jax.ShapeDtypeStruct((n_layer, m, d), jnp.bfloat16)),
        grid=(batch, n_layer),
        in_specs=in_specs,
        out_specs=(pl.BlockSpec((seq, d), lambda b, l: (b, 0)),      # resident residual
                   pl.BlockSpec((1, seq, d), lambda b, l: (l, b, 0))),  # per-layer states
        input_output_aliases={0: 0},      # h0 buffer reused for h_last
        compiler_params=pltpu.CompilerParams(
            dimension_semantics=("parallel", "arbitrary"),
            vmem_limit_bytes=VMEM_LIMIT),
    )(*args)
    return h_last, hs


def lm_head(h, wte, ln_g, ln_b, *, tile_v=128):
    """Fused final LayerNorm + tied LM head, vocab-tiled and 128-padded."""
    m, d = h.shape
    vocab = wte.shape[0]
    vocab_pad = ((vocab + tile_v - 1) // tile_v) * tile_v
    wte_p = wte if vocab_pad == vocab else jnp.pad(
        wte, ((0, vocab_pad - vocab), (0, 0)))

    logits_pad, h_final = pl.pallas_call(
        _head_kernel,
        out_shape=(jax.ShapeDtypeStruct((m, vocab_pad), jnp.float32),
                   jax.ShapeDtypeStruct((m, d), jnp.float32)),
        grid=(vocab_pad // tile_v,),
        in_specs=[pl.BlockSpec((m, d), lambda v: (0, 0)),
                  pl.BlockSpec((1, d), lambda v: (0, 0)),
                  pl.BlockSpec((1, d), lambda v: (0, 0)),
                  pl.BlockSpec((tile_v, d), lambda v: (v, 0))],
        out_specs=(pl.BlockSpec((m, tile_v), lambda v: (0, v)),   # lane-dense logits
                   pl.BlockSpec((m, d), lambda v: (0, 0))),
        compiler_params=pltpu.CompilerParams(
            dimension_semantics=("parallel",),
            vmem_limit_bytes=VMEM_LIMIT),
    )(h, ln_g, ln_b, wte_p)
    return logits_pad[:, :vocab], h_final


# ----------------------------------------------------------------------------
# Parameter init (deterministic, synthetic)
# ----------------------------------------------------------------------------
def init_params(key):
    keys = iter(jax.random.split(key, 64))   # generous deterministic key pool

    def normal(shape, std=0.02, dtype=jnp.float32):
        return (std * jax.random.normal(next(keys), shape)).astype(dtype)

    params = {
        "wte": normal((VOCAB, D), dtype=jnp.bfloat16),   # tied embedding / LM head
        "wpe": normal((MAX_POS, D)),
        "ln_f_g": jnp.ones((1, D), jnp.float32),
        "ln_f_b": jnp.zeros((1, D), jnp.float32),
    }

    per_layer = []
    for _ in range(N_LAYER):
        per_layer.append(dict(
            w_qkv=normal((D, 3 * D), dtype=jnp.bfloat16),
            b_qkv=normal((1, 3 * D)),
            w_proj=normal((D, D), dtype=jnp.bfloat16),
            b_proj=normal((1, D)),
            w_fc=normal((D, 4 * D), dtype=jnp.bfloat16),
            b_fc=normal((1, 4 * D)),
            w_mproj=normal((4 * D, D), dtype=jnp.bfloat16),
            b_mproj=normal((1, D)),
        ))
    blk = {k: jnp.stack([lyr[k] for lyr in per_layer], axis=0)
           for k in per_layer[0]}
    blk["ln1_g"] = jnp.ones((N_LAYER, 1, D), jnp.float32)
    blk["ln1_b"] = jnp.zeros((N_LAYER, 1, D), jnp.float32)
    blk["ln2_g"] = jnp.ones((N_LAYER, 1, D), jnp.float32)
    blk["ln2_b"] = jnp.zeros((N_LAYER, 1, D), jnp.float32)
    params["blk"] = blk
    return params


# ----------------------------------------------------------------------------
# GPT-2 forward (logits + hidden states), mirroring GPT2LMHeadModel semantics
# ----------------------------------------------------------------------------
def gpt2_forward(params, token_ids):
    b, s = token_ids.shape
    m = b * s

    # token + position embeddings (gather = glue, stays in plain JAX)
    emb = jnp.take(params["wte"], token_ids, axis=0).astype(jnp.float32)
    emb = emb + params["wpe"][:s].astype(jnp.float32)[None, :, :]
    h0 = emb.reshape(m, D)

    # additive causal mask, built once and VMEM-resident across all layers
    causal = jnp.tril(jnp.ones((s, s), dtype=jnp.bool_))
    mask = jnp.where(causal, 0.0, -1e30).astype(jnp.float32)

    # all transformer blocks in one pallas_call (batch-parallel x layer grid)
    h_last, hs = transformer_stack(h0, mask, params["blk"], batch=b, seq=s)

    # fused final LayerNorm + tied, vocab-tiled LM head
    logits2d, h_final = lm_head(h_last, params["wte"],
                                params["ln_f_g"], params["ln_f_b"])

    # per-layer hidden states are kept bf16 (kernel writeback is bf16 by design)
    hs_bsd = hs.reshape(N_LAYER, b, s, D)
    hidden_states = (emb,) + tuple(hs_bsd[i] for i in range(N_LAYER)) \
        + (h_final.reshape(b, s, D),)
    logits = logits2d.reshape(b, s, VOCAB)

    # TODO(synk): HF also returns attentions/past_key_values; only logits +
    # hidden_states are reproduced here.
    return {"logits": logits, "hidden_states": hidden_states}


# ----------------------------------------------------------------------------
if __name__ == "__main__":
    key = jax.random.PRNGKey(0)
    pkey, xkey = jax.random.split(key)
    params = init_params(pkey)

    token_ids = jax.random.randint(xkey, (B, S), 0, VOCAB, dtype=jnp.int32)

    fwd = jax.jit(gpt2_forward)
    out = fwd(params, token_ids)
    logits = jax.block_until_ready(out["logits"])
    last_hidden = jax.block_until_ready(out["hidden_states"][-1])

    assert logits.shape == (B, S, VOCAB)
    assert last_hidden.shape == (B, S, D)
    assert bool(jnp.all(jnp.isfinite(logits)))
    print("KERNEL_OK")
</pallas_src>

<mosaic_0001>
module attributes {stable_mosaic.version = 11 : i64} {
  func.func @_head_kernel(%arg0: i32, %arg1: memref<16x32xf32, #tpu.memory_space<vmem>>, %arg2: memref<1x32xf32, #tpu.memory_space<vmem>>, %arg3: memref<1x32xf32, #tpu.memory_space<vmem>>, %arg4: memref<128x32xbf16, #tpu.memory_space<vmem>>, %arg5: memref<16x128xf32, #tpu.memory_space<vmem>>, %arg6: memref<16x32xf32, #tpu.memory_space<vmem>>) attributes {dimension_semantics = [#tpu.dimension_semantics<parallel>], iteration_bounds = array<i64: 1>, scalar_prefetch = 0 : i64, scratch_operands = 0 : i64, tpu.core_type = #tpu.core_type<tc>, window_params = [{pipeline_mode = #tpu.pipeline_mode<synchronous>, transform_indices = @transform_0, window_bounds = array<i64: 16, 32>}, {pipeline_mode = #tpu.pipeline_mode<synchronous>, transform_indices = @transform_1, window_bounds = array<i64: 1, 32>}, {pipeline_mode = #tpu.pipeline_mode<synchronous>, transform_indices = @transform_2, window_bounds = array<i64: 1, 32>}, {transform_indices = @transform_3, window_bounds = array<i64: 128, 32>}, {transform_indices = @transform_4, window_bounds = array<i64: 16, 128>}, {pipeline_mode = #tpu.pipeline_mode<synchronous>, transform_indices = @transform_5, window_bounds = array<i64: 16, 32>}]} {
    %c0 = arith.constant 0 : index
    %c0_0 = arith.constant 0 : index
    %0 = vector.load %arg1[%c0, %c0_0] : memref<16x32xf32, #tpu.memory_space<vmem>>, vector<16x32xf32>
    %c0_1 = arith.constant 0 : index
    %c0_2 = arith.constant 0 : index
    %1 = vector.load %arg2[%c0_1, %c0_2] : memref<1x32xf32, #tpu.memory_space<vmem>>, vector<1x32xf32>
    %c0_3 = arith.constant 0 : index
    %c0_4 = arith.constant 0 : index
    %2 = vector.load %arg3[%c0_3, %c0_4] : memref<1x32xf32, #tpu.memory_space<vmem>>, vector<1x32xf32>
    %cst = arith.constant dense<0.000000e+00> : vector<16xf32>
    %3 = vector.multi_reduction <add>, %0, %cst [1] : vector<16x32xf32> to vector<16xf32>
    %4 = vector.shape_cast %3 : vector<16xf32> to vector<16x1xf32>
    %cst_5 = arith.constant 3.200000e+01 : f32
    %5 = vector.broadcast %cst_5 : f32 to vector<16x1xf32>
    %6 = arith.divf %4, %5 : vector<16x1xf32>
    %7 = vector.broadcast %6 : vector<16x1xf32> to vector<16x32xf32>
    %8 = arith.subf %0, %7 : vector<16x32xf32>
    %9 = arith.mulf %8, %8 : vector<16x32xf32>
    %cst_6 = arith.constant dense<0.000000e+00> : vector<16xf32>
    %10 = vector.multi_reduction <add>, %9, %cst_6 [1] : vector<16x32xf32> to vector<16xf32>
    %11 = vector.shape_cast %10 : vector<16xf32> to vector<16x1xf32>
    %cst_7 = arith.constant 3.200000e+01 : f32
    %12 = vector.broadcast %cst_7 : f32 to vector<16x1xf32>
    %13 = arith.divf %11, %12 : vector<16x1xf32>
    %cst_8 = arith.constant 9.99999974E-6 : f32
    %14 = vector.broadcast %cst_8 : f32 to vector<16x1xf32>
    %15 = arith.addf %13, %14 : vector<16x1xf32>
    %16 = math.rsqrt %15 : vector<16x1xf32>
    %17 = vector.broadcast %16 : vector<16x1xf32> to vector<16x32xf32>
    %18 = arith.mulf %8, %17 : vector<16x32xf32>
    %19 = vector.broadcast %1 : vector<1x32xf32> to vector<16x32xf32>
    %20 = arith.mulf %18, %19 : vector<16x32xf32>
    %21 = vector.broadcast %2 : vector<1x32xf32> to vector<16x32xf32>
    %22 = arith.addf %20, %21 : vector<16x32xf32>
    %c0_9 = arith.constant 0 : index
    %c0_10 = arith.constant 0 : index
    %23 = vector.load %arg6[%c0_9, %c0_10] : memref<16x32xf32, #tpu.memory_space<vmem>>, vector<16x32xf32>
    tpu.vector_store %arg6[%c0_9, %c0_10], %22 {strides = array<i32>} : memref<16x32xf32, #tpu.memory_space<vmem>>, vector<16x32xf32>,
    %24 = arith.truncf %22 : vector<16x32xf32> to vector<16x32xbf16>
    %c0_11 = arith.constant 0 : index
    %c0_12 = arith.constant 0 : index
    %25 = vector.load %arg4[%c0_11, %c0_12] : memref<128x32xbf16, #tpu.memory_space<vmem>>, vector<128x32xbf16>
    %cst_13 = arith.constant dense<0.000000e+00> : vector<16x128xf32>
    %26 = tpu.matmul %24, %25, %cst_13 {dimension_numbers = #tpu.dot_dimension_numbers<[1], [1], [0], [0], [0, 0, 1, 0], [], []>} : vector<16x32xbf16>, vector<128x32xbf16>, vector<16x128xf32> -> vector<16x128xf32>
    %c0_14 = arith.constant 0 : index
    %c0_15 = arith.constant 0 : index
    %27 = vector.load %arg5[%c0_14, %c0_15] : memref<16x128xf32, #tpu.memory_space<vmem>>, vector<16x128xf32>
    tpu.vector_store %arg5[%c0_14, %c0_15], %26 {strides = array<i32>} : memref<16x128xf32, #tpu.memory_space<vmem>>, vector<16x128xf32>,
    return
  }
  func.func @transform_0(%arg0: i32) -> (i32, i32) {
    %c0_i32 = arith.constant 0 : i32
    %c0_i32_0 = arith.constant 0 : i32
    %c0_i32_1 = arith.constant 0 : i32
    return %c0_i32, %c0_i32_0 : i32, i32
  }
  func.func @transform_1(%arg0: i32) -> (i32, i32) {
    %c0_i32 = arith.constant 0 : i32
    %c0_i32_0 = arith.constant 0 : i32
    %c0_i32_1 = arith.constant 0 : i32
    return %c0_i32, %c0_i32_0 : i32, i32
  }
  func.func @transform_2(%arg0: i32) -> (i32, i32) {
    %c0_i32 = arith.constant 0 : i32
    %c0_i32_0 = arith.constant 0 : i32
    %c0_i32_1 = arith.constant 0 : i32
    return %c0_i32, %c0_i32_0 : i32, i32
  }
  func.func @transform_3(%arg0: i32) -> (i32, i32) {
    %c0_i32 = arith.constant 0 : i32
    %c0_i32_0 = arith.constant 0 : i32
    return %arg0, %c0_i32 : i32, i32
  }
  func.func @transform_4(%arg0: i32) -> (i32, i32) {
    %c0_i32 = arith.constant 0 : i32
    %c0_i32_0 = arith.constant 0 : i32
    return %c0_i32, %arg0 : i32, i32
  }
  func.func @transform_5(%arg0: i32) -> (i32, i32) {
    %c0_i32 = arith.constant 0 : i32
    %c0_i32_0 = arith.constant 0 : i32
    %c0_i32_1 = arith.constant 0 : i32
    return %c0_i32, %c0_i32_0 : i32, i32
  }
}

module attributes {stable_mosaic.version = 11 : i64} {
  func.func @_block_kernel(%arg0: i32, %arg1: i32, %arg2: memref<8x32xf32, #tpu.memory_space<vmem>>, %arg3: memref<8x8xf32, #tpu.memory_space<vmem>>, %arg4: memref<1x1x32xf32, #tpu.memory_space<vmem>>, %arg5: memref<1x1x32xf32, #tpu.memory_space<vmem>>, %arg6: memref<1x32x96xbf16, #tpu.memory_space<vmem>>, %arg7: memref<1x1x96xf32, #tpu.memory_space<vmem>>, %arg8: memref<1x32x32xbf16, #tpu.memory_space<vmem>>, %arg9: memref<1x1x32xf32, #tpu.memory_space<vmem>>, %arg10: memref<1x1x32xf32, #tpu.memory_space<vmem>>, %arg11: memref<1x1x32xf32, #tpu.memory_space<vmem>>, %arg12: memref<1x32x128xbf16, #tpu.memory_space<vmem>>, %arg13: memref<1x1x128xf32, #tpu.memory_space<vmem>>, %arg14: memref<1x128x32xbf16, #tpu.memory_space<vmem>>, %arg15: memref<1x1x32xf32, #tpu.memory_space<vmem>>, %arg16: memref<8x32xf32, #tpu.memory_space<vmem>>, %arg17: memref<1x8x32xbf16, #tpu.memory_space<vmem>>) attributes {dimension_semantics = [#tpu.dimension_semantics<parallel>, #tpu.dimension_semantics<arbitrary>], iteration_bounds = array<i64: 2, 2>, scalar_prefetch = 0 : i64, scratch_operands = 0 : i64, tpu.core_type = #tpu.core_type<tc>, window_params = [{transform_indices = @transform_0, window_bounds = array<i64: 8, 32>}, {pipeline_mode = #tpu.pipeline_mode<synchronous>, transform_indices = @transform_1, window_bounds = array<i64: 8, 8>}, {transform_indices = @transform_2, window_bounds = array<i64: 1, 1, 32>}, {transform_indices = @transform_3, window_bounds = array<i64: 1, 1, 32>}, {transform_indices = @transform_4, window_bounds = array<i64: 1, 32, 96>}, {transform_indices = @transform_5, window_bounds = array<i64: 1, 1, 96>}, {transform_indices = @transform_6, window_bounds = array<i64: 1, 32, 32>}, {transform_indices = @transform_7, window_bounds = array<i64: 1, 1, 32>}, {transform_indices = @transform_8, window_bounds = array<i64: 1, 1, 32>}, {transform_indices = @transform_9, window_bounds = array<i64: 1, 1, 32>}, {transform_indices = @transform_10, window_bounds = array<i64: 1, 32, 128>}, {transform_indices = @transform_11, window_bounds = array<i64: 1, 1, 128>}, {transform_indices = @transform_12, window_bounds = array<i64: 1, 128, 32>}, {transform_indices = @transform_13, window_bounds = array<i64: 1, 1, 32>}, {transform_indices = @transform_14, window_bounds = array<i64: 8, 32>}, {transform_indices = @transform_15, window_bounds = array<i64: 1, 8, 32>}]} {
    %c0_i32 = arith.constant 0 : i32
    %0 = arith.cmpi eq, %arg1, %c0_i32 : i32
    %1 = arith.extui %0 : i1 to i32
    %c0_i32_0 = arith.constant 0 : i32
    %2 = arith.cmpi ne, %1, %c0_i32_0 : i32
    scf.if %2 {
      %c0_86 = arith.constant 0 : index
      %c0_87 = arith.constant 0 : index
      %197 = vector.load %arg2[%c0_86, %c0_87] : memref<8x32xf32, #tpu.memory_space<vmem>>, vector<8x32xf32>
      %c0_88 = arith.constant 0 : index
      %c0_89 = arith.constant 0 : index
      %198 = vector.load %arg16[%c0_88, %c0_89] : memref<8x32xf32, #tpu.memory_space<vmem>>, vector<8x32xf32>
      tpu.vector_store %arg16[%c0_88, %c0_89], %197 {strides = array<i32>} : memref<8x32xf32, #tpu.memory_space<vmem>>, vector<8x32xf32>,
    } else {
    }
    %c0 = arith.constant 0 : index
    %c0_1 = arith.constant 0 : index
    %3 = vector.load %arg16[%c0, %c0_1] : memref<8x32xf32, #tpu.memory_space<vmem>>, vector<8x32xf32>
    %c0_2 = arith.constant 0 : index
    %c0_3 = arith.constant 0 : index
    %c0_4 = arith.constant 0 : index
    %4 = vector.load %arg4[%c0_2, %c0_3, %c0_4] : memref<1x1x32xf32, #tpu.memory_space<vmem>>, vector<1x1x32xf32>
    %5 = vector.shape_cast %4 : vector<1x1x32xf32> to vector<1x32xf32>
    %c0_5 = arith.constant 0 : index
    %c0_6 = arith.constant 0 : index
    %c0_7 = arith.constant 0 : index
    %6 = vector.load %arg5[%c0_5, %c0_6, %c0_7] : memref<1x1x32xf32, #tpu.memory_space<vmem>>, vector<1x1x32xf32>
    %7 = vector.shape_cast %6 : vector<1x1x32xf32> to vector<1x32xf32>
    %cst = arith.constant dense<0.000000e+00> : vector<8xf32>
    %8 = vector.multi_reduction <add>, %3, %cst [1] : vector<8x32xf32> to vector<8xf32>
    %9 = vector.shape_cast %8 : vector<8xf32> to vector<8x1xf32>
    %cst_8 = arith.constant 3.200000e+01 : f32
    %10 = vector.broadcast %cst_8 : f32 to vector<8x1xf32>
    %11 = arith.divf %9, %10 : vector<8x1xf32>
    %12 = vector.broadcast %11 : vector<8x1xf32> to vector<8x32xf32>
    %13 = arith.subf %3, %12 : vector<8x32xf32>
    %14 = arith.mulf %13, %13 : vector<8x32xf32>
    %cst_9 = arith.constant dense<0.000000e+00> : vector<8xf32>
    %15 = vector.multi_reduction <add>, %14, %cst_9 [1] : vector<8x32xf32> to vector<8xf32>
    %16 = vector.shape_cast %15 : vector<8xf32> to vector<8x1xf32>
    %cst_10 = arith.constant 3.200000e+01 : f32
    %17 = vector.broadcast %cst_10 : f32 to vector<8x1xf32>
    %18 = arith.divf %16, %17 : vector<8x1xf32>
    %cst_11 = arith.constant 9.99999974E-6 : f32
    %19 = vector.broadcast %cst_11 : f32 to vector<8x1xf32>
    %20 = arith.addf %18, %19 : vector<8x1xf32>
    %21 = math.rsqrt %20 : vector<8x1xf32>
    %22 = vector.broadcast %21 : vector<8x1xf32> to vector<8x32xf32>
    %23 = arith.mulf %13, %22 : vector<8x32xf32>
    %24 = vector.broadcast %5 : vector<1x32xf32> to vector<8x32xf32>
    %25 = arith.mulf %23, %24 : vector<8x32xf32>
    %26 = vector.broadcast %7 : vector<1x32xf32> to vector<8x32xf32>
    %27 = arith.addf %25, %26 : vector<8x32xf32>
    %28 = arith.truncf %27 : vector<8x32xf32> to vector<8x32xbf16>
    %c0_12 = arith.constant 0 : index
    %c0_13 = arith.constant 0 : index
    %c0_14 = arith.constant 0 : index
    %29 = vector.load %arg6[%c0_12, %c0_13, %c0_14] : memref<1x32x96xbf16, #tpu.memory_space<vmem>>, vector<1x32x96xbf16>
    %30 = vector.shape_cast %29 : vector<1x32x96xbf16> to vector<32x96xbf16>
    %cst_15 = arith.constant dense<0.000000e+00> : vector<8x96xf32>
    %31 = tpu.matmul %28, %30, %cst_15 {dimension_numbers = #tpu.dot_dimension_numbers<[1], [0], [0], [1], [0, 0, 1, 1], [], []>} : vector<8x32xbf16>, vector<32x96xbf16>, vector<8x96xf32> -> vector<8x96xf32>
    %c0_16 = arith.constant 0 : index
    %c0_17 = arith.constant 0 : index
    %c0_18 = arith.constant 0 : index
    %32 = vector.load %arg7[%c0_16, %c0_17, %c0_18] : memref<1x1x96xf32, #tpu.memory_space<vmem>>, vector<1x1x96xf32>
    %33 = vector.shape_cast %32 : vector<1x1x96xf32> to vector<1x96xf32>
    %34 = vector.broadcast %33 : vector<1x96xf32> to vector<8x96xf32>
    %35 = arith.addf %31, %34 : vector<8x96xf32>
    %36 = arith.truncf %35 : vector<8x96xf32> to vector<8x96xbf16>
    %c0_19 = arith.constant 0 : index
    %c0_20 = arith.constant 0 : index
    %37 = vector.load %arg3[%c0_19, %c0_20] : memref<8x8xf32, #tpu.memory_space<vmem>>, vector<8x8xf32>
    %c0_21 = arith.constant 0 : index
    %c0_22 = arith.constant 0 : index
    %c0_23 = arith.constant 0 : index
    %38 = vector.load %arg8[%c0_21, %c0_22, %c0_23] : memref<1x32x32xbf16, #tpu.memory_space<vmem>>, vector<1x32x32xbf16>
    %39 = vector.shape_cast %38 : vector<1x32x32xbf16> to vector<32x32xbf16>
    %cst_24 = arith.constant 0.000000e+00 : f32
    %40 = vector.broadcast %cst_24 : f32 to vector<8x32xf32>
    %41 = vector.extract_strided_slice %36 {offsets = [0, 0], sizes = [8, 8], strides = [1, 1]} : vector<8x96xbf16> to vector<8x8xbf16>
    %42 = vector.extract_strided_slice %36 {offsets = [0, 32], sizes = [8, 8], strides = [1, 1]} : vector<8x96xbf16> to vector<8x8xbf16>
    %43 = vector.extract_strided_slice %36 {offsets = [0, 64], sizes = [8, 8], strides = [1, 1]} : vector<8x96xbf16> to vector<8x8xbf16>
    %cst_25 = arith.constant dense<0.000000e+00> : vector<8x8xf32>
    %44 = tpu.matmul %41, %42, %cst_25 {dimension_numbers = #tpu.dot_dimension_numbers<[1], [1], [0], [0], [0, 0, 1, 0], [], []>} : vector<8x8xbf16>, vector<8x8xbf16>, vector<8x8xf32> -> vector<8x8xf32>
    %cst_26 = arith.constant 0.353553385 : f32
    %45 = vector.broadcast %cst_26 : f32 to vector<8x8xf32>
    %46 = arith.mulf %44, %45 : vector<8x8xf32>
    %47 = arith.addf %46, %37 : vector<8x8xf32>
    %cst_27 = arith.constant dense<0xFF800000> : vector<8xf32>
    %48 = vector.multi_reduction <maximumf>, %47, %cst_27 [1] : vector<8x8xf32> to vector<8xf32>
    %49 = vector.shape_cast %48 : vector<8xf32> to vector<8x1xf32>
    %50 = vector.broadcast %49 : vector<8x1xf32> to vector<8x8xf32>
    %51 = arith.subf %47, %50 : vector<8x8xf32>
    %52 = math.exp %51 : vector<8x8xf32>
    %cst_28 = arith.constant dense<0.000000e+00> : vector<8xf32>
    %53 = vector.multi_reduction <add>, %52, %cst_28 [1] : vector<8x8xf32> to vector<8xf32>
    %54 = vector.shape_cast %53 : vector<8xf32> to vector<8x1xf32>
    %55 = tpu.reciprocal %54 {approx = true} : vector<8x1xf32> -> vector<8x1xf32>
    %56 = vector.broadcast %55 : vector<8x1xf32> to vector<8x8xf32>
    %57 = arith.mulf %52, %56 : vector<8x8xf32>
    %58 = arith.truncf %57 : vector<8x8xf32> to vector<8x8xbf16>
    %cst_29 = arith.constant dense<0.000000e+00> : vector<8x8xf32>
    %59 = tpu.matmul %58, %43, %cst_29 {dimension_numbers = #tpu.dot_dimension_numbers<[1], [0], [0], [1], [0, 0, 1, 1], [], []>} : vector<8x8xbf16>, vector<8x8xbf16>, vector<8x8xf32> -> vector<8x8xf32>
    %60 = arith.truncf %59 : vector<8x8xf32> to vector<8x8xbf16>
    %61 = vector.extract_strided_slice %39 {offsets = [0, 0], sizes = [8, 32], strides = [1, 1]} : vector<32x32xbf16> to vector<8x32xbf16>
    %cst_30 = arith.constant dense<0.000000e+00> : vector<8x32xf32>
    %62 = tpu.matmul %60, %61, %cst_30 {dimension_numbers = #tpu.dot_dimension_numbers<[1], [0], [0], [1], [0, 0, 1, 1], [], []>} : vector<8x8xbf16>, vector<8x32xbf16>, vector<8x32xf32> -> vector<8x32xf32>
    %63 = arith.addf %40, %62 : vector<8x32xf32>
    %64 = vector.extract_strided_slice %36 {offsets = [0, 8], sizes = [8, 8], strides = [1, 1]} : vector<8x96xbf16> to vector<8x8xbf16>
    %65 = vector.extract_strided_slice %36 {offsets = [0, 40], sizes = [8, 8], strides = [1, 1]} : vector<8x96xbf16> to vector<8x8xbf16>
    %66 = vector.extract_strided_slice %36 {offsets = [0, 72], sizes = [8, 8], strides = [1, 1]} : vector<8x96xbf16> to vector<8x8xbf16>
    %cst_31 = arith.constant dense<0.000000e+00> : vector<8x8xf32>
    %67 = tpu.matmul %64, %65, %cst_31 {dimension_numbers = #tpu.dot_dimension_numbers<[1], [1], [0], [0], [0, 0, 1, 0], [], []>} : vector<8x8xbf16>, vector<8x8xbf16>, vector<8x8xf32> -> vector<8x8xf32>
    %cst_32 = arith.constant 0.353553385 : f32
    %68 = vector.broadcast %cst_32 : f32 to vector<8x8xf32>
    %69 = arith.mulf %67, %68 : vector<8x8xf32>
    %70 = arith.addf %69, %37 : vector<8x8xf32>
    %cst_33 = arith.constant dense<0xFF800000> : vector<8xf32>
    %71 = vector.multi_reduction <maximumf>, %70, %cst_33 [1] : vector<8x8xf32> to vector<8xf32>
    %72 = vector.shape_cast %71 : vector<8xf32> to vector<8x1xf32>
    %73 = vector.broadcast %72 : vector<8x1xf32> to vector<8x8xf32>
    %74 = arith.subf %70, %73 : vector<8x8xf32>
    %75 = math.exp %74 : vector<8x8xf32>
    %cst_34 = arith.constant dense<0.000000e+00> : vector<8xf32>
    %76 = vector.multi_reduction <add>, %75, %cst_34 [1] : vector<8x8xf32> to vector<8xf32>
    %77 = vector.shape_cast %76 : vector<8xf32> to vector<8x1xf32>
    %78 = tpu.reciprocal %77 {approx = true} : vector<8x1xf32> -> vector<8x1xf32>
    %79 = vector.broadcast %78 : vector<8x1xf32> to vector<8x8xf32>
    %80 = arith.mulf %75, %79 : vector<8x8xf32>
    %81 = arith.truncf %80 : vector<8x8xf32> to vector<8x8xbf16>
    %cst_35 = arith.constant dense<0.000000e+00> : vector<8x8xf32>
    %82 = tpu.matmul %81, %66, %cst_35 {dimension_numbers = #tpu.dot_dimension_numbers<[1], [0], [0], [1], [0, 0, 1, 1], [], []>} : vector<8x8xbf16>, vector<8x8xbf16>, vector<8x8xf32> -> vector<8x8xf32>
    %83 = arith.truncf %82 : vector<8x8xf32> to vector<8x8xbf16>
    %84 = vector.extract_strided_slice %39 {offsets = [8, 0], sizes = [8, 32], strides = [1, 1]} : vector<32x32xbf16> to vector<8x32xbf16>
    %cst_36 = arith.constant dense<0.000000e+00> : vector<8x32xf32>
    %85 = tpu.matmul %83, %84, %cst_36 {dimension_numbers = #tpu.dot_dimension_numbers<[1], [0], [0], [1], [0, 0, 1, 1], [], []>} : vector<8x8xbf16>, vector<8x32xbf16>, vector<8x32xf32> -> vector<8x32xf32>
    %86 = arith.addf %63, %85 : vector<8x32xf32>
    %87 = vector.extract_strided_slice %36 {offsets = [0, 16], sizes = [8, 8], strides = [1, 1]} : vector<8x96xbf16> to vector<8x8xbf16>
    %88 = vector.extract_strided_slice %36 {offsets = [0, 48], sizes = [8, 8], strides = [1, 1]} : vector<8x96xbf16> to vector<8x8xbf16>
    %89 = vector.extract_strided_slice %36 {offsets = [0, 80], sizes = [8, 8], strides = [1, 1]} : vector<8x96xbf16> to vector<8x8xbf16>
    %cst_37 = arith.constant dense<0.000000e+00> : vector<8x8xf32>
    %90 = tpu.matmul %87, %88, %cst_37 {dimension_numbers = #tpu.dot_dimension_numbers<[1], [1], [0], [0], [0, 0, 1, 0], [], []>} : vector<8x8xbf16>, vector<8x8xbf16>, vector<8x8xf32> -> vector<8x8xf32>
    %cst_38 = arith.constant 0.353553385 : f32
    %91 = vector.broadcast %cst_38 : f32 to vector<8x8xf32>
    %92 = arith.mulf %90, %91 : vector<8x8xf32>
    %93 = arith.addf %92, %37 : vector<8x8xf32>
    %cst_39 = arith.constant dense<0xFF800000> : vector<8xf32>
    %94 = vector.multi_reduction <maximumf>, %93, %cst_39 [1] : vector<8x8xf32> to vector<8xf32>
    %95 = vector.shape_cast %94 : vector<8xf32> to vector<8x1xf32>
    %96 = vector.broadcast %95 : vector<8x1xf32> to vector<8x8xf32>
    %97 = arith.subf %93, %96 : vector<8x8xf32>
    %98 = math.exp %97 : vector<8x8xf32>
    %cst_40 = arith.constant dense<0.000000e+00> : vector<8xf32>
    %99 = vector.multi_reduction <add>, %98, %cst_40 [1] : vector<8x8xf32> to vector<8xf32>
    %100 = vector.shape_cast %99 : vector<8xf32> to vector<8x1xf32>
    %101 = tpu.reciprocal %100 {approx = true} : vector<8x1xf32> -> vector<8x1xf32>
    %102 = vector.broadcast %101 : vector<8x1xf32> to vector<8x8xf32>
    %103 = arith.mulf %98, %102 : vector<8x8xf32>
    %104 = arith.truncf %103 : vector<8x8xf32> to vector<8x8xbf16>
    %cst_41 = arith.constant dense<0.000000e+00> : vector<8x8xf32>
    %105 = tpu.matmul %104, %89, %cst_41 {dimension_numbers = #tpu.dot_dimension_numbers<[1], [0], [0], [1], [0, 0, 1, 1], [], []>} : vector<8x8xbf16>, vector<8x8xbf16>, vector<8x8xf32> -> vector<8x8xf32>
    %106 = arith.truncf %105 : vector<8x8xf32> to vector<8x8xbf16>
    %107 = vector.extract_strided_slice %39 {offsets = [16, 0], sizes = [8, 32], strides = [1, 1]} : vector<32x32xbf16> to vector<8x32xbf16>
    %cst_42 = arith.constant dense<0.000000e+00> : vector<8x32xf32>
    %108 = tpu.matmul %106, %107, %cst_42 {dimension_numbers = #tpu.dot_dimension_numbers<[1], [0], [0], [1], [0, 0, 1, 1], [], []>} : vector<8x8xbf16>, vector<8x32xbf16>, vector<8x32xf32> -> vector<8x32xf32>
    %109 = arith.addf %86, %108 : vector<8x32xf32>
    %110 = vector.extract_strided_slice %36 {offsets = [0, 24], sizes = [8, 8], strides = [1, 1]} : vector<8x96xbf16> to vector<8x8xbf16>
    %111 = vector.extract_strided_slice %36 {offsets = [0, 56], sizes = [8, 8], strides = [1, 1]} : vector<8x96xbf16> to vector<8x8xbf16>
    %112 = vector.extract_strided_slice %36 {offsets = [0, 88], sizes = [8, 8], strides = [1, 1]} : vector<8x96xbf16> to vector<8x8xbf16>
    %cst_43 = arith.constant dense<0.000000e+00> : vector<8x8xf32>
    %113 = tpu.matmul %110, %111, %cst_43 {dimension_numbers = #tpu.dot_dimension_numbers<[1], [1], [0], [0], [0, 0, 1, 0], [], []>} : vector<8x8xbf16>, vector<8x8xbf16>, vector<8x8xf32> -> vector<8x8xf32>
    %cst_44 = arith.constant 0.353553385 : f32
    %114 = vector.broadcast %cst_44 : f32 to vector<8x8xf32>
    %115 = arith.mulf %113, %114 : vector<8x8xf32>
    %116 = arith.addf %115, %37 : vector<8x8xf32>
    %cst_45 = arith.constant dense<0xFF800000> : vector<8xf32>
    %117 = vector.multi_reduction <maximumf>, %116, %cst_45 [1] : vector<8x8xf32> to vector<8xf32>
    %118 = vector.shape_cast %117 : vector<8xf32> to vector<8x1xf32>
    %119 = vector.broadcast %118 : vector<8x1xf32> to vector<8x8xf32>
    %120 = arith.subf %116, %119 : vector<8x8xf32>
    %121 = math.exp %120 : vector<8x8xf32>
    %cst_46 = arith.constant dense<0.000000e+00> : vector<8xf32>
    %122 = vector.multi_reduction <add>, %121, %cst_46 [1] : vector<8x8xf32> to vector<8xf32>
    %123 = vector.shape_cast %122 : vector<8xf32> to vector<8x1xf32>
    %124 = tpu.reciprocal %123 {approx = true} : vector<8x1xf32> -> vector<8x1xf32>
    %125 = vector.broadcast %124 : vector<8x1xf32> to vector<8x8xf32>
    %126 = arith.mulf %121, %125 : vector<8x8xf32>
    %127 = arith.truncf %126 : vector<8x8xf32> to vector<8x8xbf16>
    %cst_47 = arith.constant dense<0.000000e+00> : vector<8x8xf32>
    %128 = tpu.matmul %127, %112, %cst_47 {dimension_numbers = #tpu.dot_dimension_numbers<[1], [0], [0], [1], [0, 0, 1, 1], [], []>} : vector<8x8xbf16>, vector<8x8xbf16>, vector<8x8xf32> -> vector<8x8xf32>
    %129 = arith.truncf %128 : vector<8x8xf32> to vector<8x8xbf16>
    %130 = vector.extract_strided_slice %39 {offsets = [24, 0], sizes = [8, 32], strides = [1, 1]} : vector<32x32xbf16> to vector<8x32xbf16>
    %cst_48 = arith.constant dense<0.000000e+00> : vector<8x32xf32>
    %131 = tpu.matmul %129, %130, %cst_48 {dimension_numbers = #tpu.dot_dimension_numbers<[1], [0], [0], [1], [0, 0, 1, 1], [], []>} : vector<8x8xbf16>, vector<8x32xbf16>, vector<8x32xf32> -> vector<8x32xf32>
    %132 = arith.addf %109, %131 : vector<8x32xf32>
    %133 = arith.addf %3, %132 : vector<8x32xf32>
    %c0_49 = arith.constant 0 : index
    %c0_50 = arith.constant 0 : index
    %c0_51 = arith.constant 0 : index
    %134 = vector.load %arg9[%c0_49, %c0_50, %c0_51] : memref<1x1x32xf32, #tpu.memory_space<vmem>>, vector<1x1x32xf32>
    %135 = vector.shape_cast %134 : vector<1x1x32xf32> to vector<1x32xf32>
    %136 = vector.broadcast %135 : vector<1x32xf32> to vector<8x32xf32>
    %137 = arith.addf %133, %136 : vector<8x32xf32>
    %c0_52 = arith.constant 0 : index
    %c0_53 = arith.constant 0 : index
    %c0_54 = arith.constant 0 : index
    %138 = vector.load %arg10[%c0_52, %c0_53, %c0_54] : memref<1x1x32xf32, #tpu.memory_space<vmem>>, vector<1x1x32xf32>
    %139 = vector.shape_cast %138 : vector<1x1x32xf32> to vector<1x32xf32>
    %c0_55 = arith.constant 0 : index
    %c0_56 = arith.constant 0 : index
    %c0_57 = arith.constant 0 : index
    %140 = vector.load %arg11[%c0_55, %c0_56, %c0_57] : memref<1x1x32xf32, #tpu.memory_space<vmem>>, vector<1x1x32xf32>
    %141 = vector.shape_cast %140 : vector<1x1x32xf32> to vector<1x32xf32>
    %cst_58 = arith.constant dense<0.000000e+00> : vector<8xf32>
    %142 = vector.multi_reduction <add>, %137, %cst_58 [1] : vector<8x32xf32> to vector<8xf32>
    %143 = vector.shape_cast %142 : vector<8xf32> to vector<8x1xf32>
    %cst_59 = arith.constant 3.200000e+01 : f32
    %144 = vector.broadcast %cst_59 : f32 to vector<8x1xf32>
    %145 = arith.divf %143, %144 : vector<8x1xf32>
    %146 = vector.broadcast %145 : vector<8x1xf32> to vector<8x32xf32>
    %147 = arith.subf %137, %146 : vector<8x32xf32>
    %148 = arith.mulf %147, %147 : vector<8x32xf32>
    %cst_60 = arith.constant dense<0.000000e+00> : vector<8xf32>
    %149 = vector.multi_reduction <add>, %148, %cst_60 [1] : vector<8x32xf32> to vector<8xf32>
    %150 = vector.shape_cast %149 : vector<8xf32> to vector<8x1xf32>
    %cst_61 = arith.constant 3.200000e+01 : f32
    %151 = vector.broadcast %cst_61 : f32 to vector<8x1xf32>
    %152 = arith.divf %150, %151 : vector<8x1xf32>
    %cst_62 = arith.constant 9.99999974E-6 : f32
    %153 = vector.broadcast %cst_62 : f32 to vector<8x1xf32>
    %154 = arith.addf %152, %153 : vector<8x1xf32>
    %155 = math.rsqrt %154 : vector<8x1xf32>
    %156 = vector.broadcast %155 : vector<8x1xf32> to vector<8x32xf32>
    %157 = arith.mulf %147, %156 : vector<8x32xf32>
    %158 = vector.broadcast %139 : vector<1x32xf32> to vector<8x32xf32>
    %159 = arith.mulf %157, %158 : vector<8x32xf32>
    %160 = vector.broadcast %141 : vector<1x32xf32> to vector<8x32xf32>
    %161 = arith.addf %159, %160 : vector<8x32xf32>
    %162 = arith.truncf %161 : vector<8x32xf32> to vector<8x32xbf16>
    %c0_63 = arith.constant 0 : index
    %c0_64 = arith.constant 0 : index
    %c0_65 = arith.constant 0 : index
    %163 = vector.load %arg12[%c0_63, %c0_64, %c0_65] : memref<1x32x128xbf16, #tpu.memory_space<vmem>>, vector<1x32x128xbf16>
    %164 = vector.shape_cast %163 : vector<1x32x128xbf16> to vector<32x128xbf16>
    %cst_66 = arith.constant dense<0.000000e+00> : vector<8x128xf32>
    %165 = tpu.matmul %162, %164, %cst_66 {dimension_numbers = #tpu.dot_dimension_numbers<[1], [0], [0], [1], [0, 0, 1, 1], [], []>} : vector<8x32xbf16>, vector<32x128xbf16>, vector<8x128xf32> -> vector<8x128xf32>
    %c0_67 = arith.constant 0 : index
    %c0_68 = arith.constant 0 : index
    %c0_69 = arith.constant 0 : index
    %166 = vector.load %arg13[%c0_67, %c0_68, %c0_69] : memref<1x1x128xf32, #tpu.memory_space<vmem>>, vector<1x1x128xf32>
    %167 = vector.shape_cast %166 : vector<1x1x128xf32> to vector<1x128xf32>
    %168 = vector.broadcast %167 : vector<1x128xf32> to vector<8x128xf32>
    %169 = arith.addf %165, %168 : vector<8x128xf32>
    %cst_70 = arith.constant 5.000000e-01 : f32
    %170 = vector.broadcast %cst_70 : f32 to vector<8x128xf32>
    %171 = arith.mulf %170, %169 : vector<8x128xf32>
    %cst_71 = arith.constant 4.471500e-02 : f32
    %172 = vector.broadcast %cst_71 : f32 to vector<8x128xf32>
    %173 = arith.mulf %172, %169 : vector<8x128xf32>
    %174 = arith.mulf %173, %169 : vector<8x128xf32>
    %175 = arith.mulf %174, %169 : vector<8x128xf32>
    %176 = arith.addf %169, %175 : vector<8x128xf32>
    %cst_72 = arith.constant 0.797884583 : f32
    %177 = vector.broadcast %cst_72 : f32 to vector<8x128xf32>
    %178 = arith.mulf %177, %176 : vector<8x128xf32>
    %179 = math.tanh %178 : vector<8x128xf32>
    %cst_73 = arith.constant 1.000000e+00 : f32
    %180 = vector.broadcast %cst_73 : f32 to vector<8x128xf32>
    %181 = arith.addf %180, %179 : vector<8x128xf32>
    %182 = arith.mulf %171, %181 : vector<8x128xf32>
    %183 = arith.truncf %182 : vector<8x128xf32> to vector<8x128xbf16>
    %c0_74 = arith.constant 0 : index
    %c0_75 = arith.constant 0 : index
    %c0_76 = arith.constant 0 : index
    %184 = vector.load %arg14[%c0_74, %c0_75, %c0_76] : memref<1x128x32xbf16, #tpu.memory_space<vmem>>, vector<1x128x32xbf16>
    %185 = vector.shape_cast %184 : vector<1x128x32xbf16> to vector<128x32xbf16>
    %cst_77 = arith.constant dense<0.000000e+00> : vector<8x32xf32>
    %186 = tpu.matmul %183, %185, %cst_77 {dimension_numbers = #tpu.dot_dimension_numbers<[1], [0], [0], [1], [0, 0, 1, 1], [], []>} : vector<8x128xbf16>, vector<128x32xbf16>, vector<8x32xf32> -> vector<8x32xf32>
    %c0_78 = arith.constant 0 : index
    %c0_79 = arith.constant 0 : index
    %c0_80 = arith.constant 0 : index
    %187 = vector.load %arg15[%c0_78, %c0_79, %c0_80] : memref<1x1x32xf32, #tpu.memory_space<vmem>>, vector<1x1x32xf32>
    %188 = vector.shape_cast %187 : vector<1x1x32xf32> to vector<1x32xf32>
    %189 = vector.broadcast %188 : vector<1x32xf32> to vector<8x32xf32>
    %190 = arith.addf %186, %189 : vector<8x32xf32>
    %191 = arith.addf %137, %190 : vector<8x32xf32>
    %c0_81 = arith.constant 0 : index
    %c0_82 = arith.constant 0 : index
    %192 = vector.load %arg16[%c0_81, %c0_82] : memref<8x32xf32, #tpu.memory_space<vmem>>, vector<8x32xf32>
    tpu.vector_store %arg16[%c0_81, %c0_82], %191 {strides = array<i32>} : memref<8x32xf32, #tpu.memory_space<vmem>>, vector<8x32xf32>,
    %193 = arith.truncf %191 : vector<8x32xf32> to vector<8x32xbf16>
    %c0_83 = arith.constant 0 : index
    %c0_84 = arith.constant 0 : index
    %c0_85 = arith.constant 0 : index
    %194 = vector.load %arg17[%c0_83, %c0_84, %c0_85] : memref<1x8x32xbf16, #tpu.memory_space<vmem>>, vector<1x8x32xbf16>
    %195 = vector.shape_cast %194 : vector<1x8x32xbf16> to vector<8x32xbf16>
    %196 = vector.shape_cast %193 : vector<8x32xbf16> to vector<1x8x32xbf16>
    tpu.vector_store %arg17[%c0_83, %c0_84, %c0_85], %196 {strides = array<i32>} : memref<1x8x32xbf16, #tpu.memory_space<vmem>>, vector<1x8x32xbf16>,
    return
  }
  func.func @transform_0(%arg0: i32, %arg1: i32) -> (i32, i32) {
    %c0_i32 = arith.constant 0 : i32
    %c0_i32_0 = arith.constant 0 : i32
    return %arg0, %c0_i32 : i32, i32
  }
  func.func @transform_1(%arg0: i32, %arg1: i32) -> (i32, i32) {
    %c0_i32 = arith.constant 0 : i32
    %c0_i32_0 = arith.constant 0 : i32
    %c0_i32_1 = arith.constant 0 : i32
    return %c0_i32, %c0_i32_0 : i32, i32
  }
  func.func @transform_2(%arg0: i32, %arg1: i32) -> (i32, i32, i32) {
    %c0_i32 = arith.constant 0 : i32
    %c0_i32_0 = arith.constant 0 : i32
    %c0_i32_1 = arith.constant 0 : i32
    return %arg1, %c0_i32, %c0_i32_0 : i32, i32, i32
  }
  func.func @transform_3(%arg0: i32, %arg1: i32) -> (i32, i32, i32) {
    %c0_i32 = arith.constant 0 : i32
    %c0_i32_0 = arith.constant 0 : i32
    %c0_i32_1 = arith.constant 0 : i32
    return %arg1, %c0_i32, %c0_i32_0 : i32, i32, i32
  }
  func.func @transform_4(%arg0: i32, %arg1: i32) -> (i32, i32, i32) {
    %c0_i32 = arith.constant 0 : i32
    %c0_i32_0 = arith.constant 0 : i32
    %c0_i32_1 = arith.constant 0 : i32
    return %arg1, %c0_i32, %c0_i32_0 : i32, i32, i32
  }
  func.func @transform_5(%arg0: i32, %arg1: i32) -> (i32, i32, i32) {
    %c0_i32 = arith.constant 0 : i32
    %c0_i32_0 = arith.constant 0 : i32
    %c0_i32_1 = arith.constant 0 : i32
    return %arg1, %c0_i32, %c0_i32_0 : i32, i32, i32
  }
  func.func @transform_6(%arg0: i32, %arg1: i32) -> (i32, i32, i32) {
    %c0_i32 = arith.constant 0 : i32
    %c0_i32_0 = arith.constant 0 : i32
    %c0_i32_1 = arith.constant 0 : i32
    return %arg1, %c0_i32, %c0_i32_0 : i32, i32, i32
  }
  func.func @transform_7(%arg0: i32, %arg1: i32) -> (i32, i32, i32) {
    %c0_i32 = arith.constant 0 : i32
    %c0_i32_0 = arith.constant 0 : i32
    %c0_i32_1 = arith.constant 0 : i32
    return %arg1, %c0_i32, %c0_i32_0 : i32, i32, i32
  }
  func.func @transform_8(%arg0: i32, %arg1: i32) -> (i32, i32, i32) {
    %c0_i32 = arith.constant 0 : i32
    %c0_i32_0 = arith.constant 0 : i32
    %c0_i32_1 = arith.constant 0 : i32
    return %arg1, %c0_i32, %c0_i32_0 : i32, i32, i32
  }
  func.func @transform_9(%arg0: i32, %arg1: i32) -> (i32, i32, i32) {
    %c0_i32 = arith.constant 0 : i32
    %c0_i32_0 = arith.constant 0 : i32
    %c0_i32_1 = arith.constant 0 : i32
    return %arg1, %c0_i32, %c0_i32_0 : i32, i32, i32
  }
  func.func @transform_10(%arg0: i32, %arg1: i32) -> (i32, i32, i32) {
    %c0_i32 = arith.constant 0 : i32
    %c0_i32_0 = arith.constant 0 : i32
    %c0_i32_1 = arith.constant 0 : i32
    return %arg1, %c0_i32, %c0_i32_0 : i32, i32, i32
  }
  func.func @transform_11(%arg0: i32, %arg1: i32) -> (i32, i32, i32) {
    %c0_i32 = arith.constant 0 : i32
    %c0_i32_0 = arith.constant 0 : i32
    %c0_i32_1 = arith.constant 0 : i32
    return %arg1, %c0_i32, %c0_i32_0 : i32, i32, i32
  }
  func.func @transform_12(%arg0: i32, %arg1: i32) -> (i32, i32, i32) {
    %c0_i32 = arith.constant 0 : i32
    %c0_i32_0 = arith.constant 0 : i32
    %c0_i32_1 = arith.constant 0 : i32
    return %arg1, %c0_i32, %c0_i32_0 : i32, i32, i32
  }
  func.func @transform_13(%arg0: i32, %arg1: i32) -> (i32, i32, i32) {
    %c0_i32 = arith.constant 0 : i32
    %c0_i32_0 = arith.constant 0 : i32
    %c0_i32_1 = arith.constant 0 : i32
    return %arg1, %c0_i32, %c0_i32_0 : i32, i32, i32
  }
  func.func @transform_14(%arg0: i32, %arg1: i32) -> (i32, i32) {
    %c0_i32 = arith.constant 0 : i32
    %c0_i32_0 = arith.constant 0 : i32
    return %arg0, %c0_i32 : i32, i32
  }
  func.func @transform_15(%arg0: i32, %arg1: i32) -> (i32, i32, i32) {
    %c0_i32 = arith.constant 0 : i32
    %c0_i32_0 = arith.constant 0 : i32
    return %arg1, %arg0, %c0_i32 : i32, i32, i32
  }
}

</mosaic_0001>

<bundles_post_ra>
// kernel: gpt2_forward.3
= control target key start
LH: loop header
LB: loop body
LE: loop exit
PB: predicated region body
PF: predicated region fallthrough
CT: control target
= control target key end

     0   :  { %vm25_vm0 = vcmask 261120   ;;  %s403_s0 = inlined_call_operand.vmem [shape: f32[16,32], index: 0, kind: input, shape index: {}]   ;;  %s404_s1 = inlined_call_operand.vmem [shape: f32[1,32], index: 1, kind: input, shape index: {}]   ;;  %s405_s2 = inlined_call_operand.vmem [shape: f32[1,32], index: 2, kind: input, shape index: {}]   ;;  %s406_s3 = inlined_call_operand.vmem [shape: bf16[128,32], index: 3, kind: input, shape index: {}]   ;;  %s407_s4 = inlined_call_operand.vmem [shape: f32[16,128], index: 4, kind: output, shape index: {0}]   ;;  %s408_s5 = inlined_call_operand.hbm [shape: f32[16,32], index: 5, kind: output, shape index: {1}]  }
   0x1   :  { %v21_v0 = vld [vmem:[%s403_s0] sm:$0xff]  ;;  %v22_v1 = vld [vmem:[%s403_s0 + $0x8] sm:$0xff] }
   0x2   :  { %v26_v2 = vsel %vm25_vm0, %v21_v0, 0.0  ;;  %v29_v3 = vsel %vm25_vm0, %v22_v1, 0.0 }
   0x3   :  { %27 = vadd.xlane.f32.xlu0 %v26_v2 }
   0x7   :  { %30 = vadd.xlane.f32.xlu0 %v29_v3 }
   0x8   :  { %11 = vsyncpa [#allocation3], 0  ;;  %v263_v4 = vld [vmem:[%s406_s3] sm:$0xff]   ;;  %v299_v5 = vmov 0.0   ;;  %v264_v7 = vld [vmem:[%s406_s3 + $0x8] sm:$0xff]   ;;  %vm300_vm1 = vmmov 0  }
   0x9   :  { %238 = vmatprep.subr.bf16.mxu0 %v299_v5  ;;  %v132_v6 = vsel %vm25_vm0, %v263_v4, 0  ;;  %v135_v8 = vsel %vm25_vm0, %v264_v7, 0  ;;  %v265_v9 = vld [vmem:[%s406_s3 + $0x10] sm:$0xff]   ;;  %v266_v11 = vld [vmem:[%s406_s3 + $0x18] sm:$0xff]   ;;  %v267_v13 = vld [vmem:[%s406_s3 + $0x20] sm:$0xff]   ;;  %254 = vmatprep.mubr.msk.bf16.mxu0 %vm300_vm1, %v299_v5  ;;  %s301_s15 = smov [#allocation2]  }
   0xa   :  { %239 = vmatpush3.bf16.xpose.msra.mxu0 %v132_v6  ;;  %v138_v10 = vsel %vm25_vm0, %v265_v9, 0  ;;  %v141_v12 = vsel %vm25_vm0, %v266_v11, 0  ;;  %v144_v14 = vsel %vm25_vm0, %v267_v13, 0  ;;  %v268_v25 = vld [vmem:[%s406_s3 + $0x28] sm:$0xff]   ;;  %v269_v27 = vld [vmem:[%s406_s3 + $0x30] sm:$0xff]   ;;  %v270_v29 = vld [vmem:[%s406_s3 + $0x38] sm:$0xff]  }
   0xb   :  { %240 = vmatprep.subr.bf16.mxu0 %v299_v5  ;;  %v147_v26 = vsel %vm25_vm0, %v268_v25, 0  ;;  %v150_v28 = vsel %vm25_vm0, %v269_v27, 0  ;;  %v153_v30 = vsel %vm25_vm0, %v270_v29, 0  ;;  %v218_v38 = vld [vmem:[%s404_s1] ss:$0 sm:$0xff]  ;;  %s205_s1 = sshll.u32 %s301_s15, 4  ;;  %s206_s1 = int_to_ptr.vmem [resolvable:$true] %s205_s1 }
   0xc   :  { %v219_v40 = vld [vmem:[%s405_s2] ss:$0 sm:$0xff]  ;;  %s275_s16 = scalar_lea.vmem %s206_s1, 256  ;;  %p280_p1 = scmp.lt.s32.totalorder %s206_s1, %s206_s1 }
   0xd   :  { %p276_p0 = scmp.ne.s32.totalorder %s206_s1, %s275_s16  ;;  %p281_p2 = scmp.lt.s32.totalorder %s275_s16, %s275_s16 }
   0xf   :  { %p282_p3 = por %p281_p2, %p280_p1 }
  0x11   :  { %p283_p4 = pnand %p282_p3, %p276_p0 }
  0x12   :  { %241 = vmatpush3.bf16.xpose.msra.mxu0 %v135_v8 }
  0x13   :  { %242 = vmatprep.subr.bf16.mxu0 %v299_v5 }
  0x1a   :  { %243 = vmatpush3.bf16.xpose.msra.mxu0 %v138_v10 }
  0x1b   :  { %244 = vmatprep.subr.bf16.mxu0 %v299_v5 }
  0x22   :  { %245 = vmatpush3.bf16.xpose.msra.mxu0 %v141_v12 }
  0x23   :  { %246 = vmatprep.subr.bf16.mxu0 %v299_v5 }
  0x2a   :  { %247 = vmatpush3.bf16.xpose.msra.mxu0 %v144_v14 }
  0x2b   :  { %248 = vmatprep.subr.bf16.mxu0 %v299_v5 }
  0x32   :  { %249 = vmatpush3.bf16.xpose.msra.mxu0 %v147_v26 }
  0x33   :  { %250 = vmatprep.subr.bf16.mxu0 %v299_v5 }
  0x3a   :  { %251 = vmatpush3.bf16.xpose.msra.mxu0 %v150_v28 }
  0x3b   :  { %252 = vmatprep.subr.bf16.mxu0 %v299_v5 }
  0x42   :  { %253 = vmatpush3.bf16.xpose.msra.mxu0 %v153_v30 }
  0x90   :  { %v28_v15 = vpop.xlane.xlu0 %27 }
  0x91   :  { %v33_v16 = vmul.f32 0.03125, %v28_v15 }
  0x93   :  { %v35_v17 = vsub.f32 %v21_v0, %v33_v16 }
  0x94   :  { %v31_v18 = vpop.xlane.xlu0 %30 }
  0x95   :  { %v34_v19 = vmul.f32 0.03125, %v31_v18  ;;  %v37_v20 = vmul.f32 %v35_v17, %v35_v17 }
  0x97   :  { %v36_v21 = vsub.f32 %v22_v1, %v34_v19  ;;  %v39_v22 = vsel %vm25_vm0, %v37_v20, 0.0 }
  0x98   :  { %40 = vadd.xlane.f32.xlu1 %v39_v22 }
  0x99   :  { %v38_v23 = vmul.f32 %v36_v21, %v36_v21 }
  0x9b   :  { %v42_v24 = vsel %vm25_vm0, %v38_v23, 0.0 }
  0x9c   :  { %43 = vadd.xlane.f32.xlu1 %v42_v24 }
 0x125   :  { %v41_v31 = vpop.xlane.xlu1 %40 }
 0x126   :  { %v45_v32 = vmul.f32 0.03125, %v41_v31 }
 0x128   :  { %v47_v33 = vadd.f32 1e-05, %v45_v32 }
 0x129   :  { %v44_v34 = vpop.xlane.xlu1 %43 }
 0x12a   :  { %271 = vrsqrt.f32 %v47_v33  ;;  %v46_v35 = vmul.f32 0.03125, %v44_v34 }
 0x12c   :  { %v48_v36 = vadd.f32 1e-05, %v46_v35 }
 0x12e   :  { %273 = vrsqrt.f32 %v48_v36 }
 0x134   :  { %v272_v37 = vpop.eup %271 }
 0x135   :  { %v51_v39 = vmul.f32 %v272_v37, %v35_v17 }
 0x137   :  { %v59_v41 = vmul.f32 %v218_v38, %v51_v39 }
 0x138   :  { %v274_v42 = vpop.eup %273 }
 0x139   :  { %v52_v43 = vmul.f32 %v274_v42, %v36_v21  ;;  %v67_v44 = vadd.f32 %v219_v40, %v59_v41 }
 0x13b   :  { %v60_v45 = vmul.f32 %v218_v38, %v52_v43  ;;  %69 = vst.msk [vmem:[#allocation2] sm:$0xff] %vm25_vm0, %v67_v44 }
 0x13d   :  { %v68_v46 = vadd.f32 %v219_v40, %v60_v45 }
 0x13f   :  { %v71_v47 = vpack.c.bf16 %v68_v46, %v67_v44  ;;  %70 = vst.msk [vmem:[#allocation2 + $0x8] sm:$0xff] %vm25_vm0, %v68_v46 }
 0x141   :  { %255 = vmatmul.mubr.msk.bf16.vlgmr.msra.gmra.mrb[0].mxu0 %vm25_vm0, %v71_v47 }
 0x142   :  { %286 = shalt.err (!%p283_p4)
}
 0x143   :  { %s287_s18 = scalar_lea.hbm %s408_s5, 256 }
 0x144   :  { %p288_p5 = scmp.ne.s32.totalorder %s408_s5, %s287_s18  ;;  %p291_p6 = scmp.lt.u32.totalorder %s287_s18, %s408_s5 }
 0x146   :  { %p293_p7 = pnand %p291_p6, %p288_p5 }
 0x148   :  { %296 = shalt.err (!%p293_p7)
}
 0x149   :  { %s302_s23 = smov 128   ;;  %s303_s24 = smov 8  }
 0x14a   :  { %211 = dma.vmem_to_hbm [thread:$0]  %s206_s1, 256, %s408_s5, [#allocation3], %s302_s23, %s302_s23, %s303_s24  }
 0x214   :  { %v189_v48 = vpop.f32.mrb[0].mxu0 }
 0x215   :  { %196 = vst [vmem:[%s407_s4] sm:$0xff] %v189_v48  ;;  %v256_v49 = vpop.f32.mrb[1].mxu0 }
 0x216   :  { %v192_v50 = vpop.f32.mrb[2].mxu0 }
 0x217   :  { %197 = vst [vmem:[%s407_s4 + $0x8] sm:$0xff] %v192_v50  ;;  %v257_v51 = vpop.f32.mrb[3].mxu0 }
 0x218   :  { %297 = dma.done.wait [#allocation3], 256  }
 0x219   :  { %298 = vsyncadd [#allocation3], 4294967040 }
 0x21a   :  { %217 = vsyncpa [#allocation3], 1 }

// kernel: gpt2_forward.2
= control target key start
LH: loop header
LB: loop body
LE: loop exit
PB: predicated region body
PF: predicated region fallthrough
CT: control target
= control target key end

     0   :  { %s2354_s18 = smov 0   ;;  %s2356_s19 = smov 0   ;;  %s2663_s0 = inlined_call_operand.vmem [shape: f32[16,32], index: 0, kind: input, shape index: {}, may-alias: {0,14}]   ;;  %s2664_s1 = inlined_call_operand.vmem [shape: f32[8,8], index: 1, kind: input, shape index: {}]   ;;  %s2665_s2 = inlined_call_operand.vmem [shape: f32[2,1,32], index: 2, kind: input, shape index: {}]   ;;  %s2666_s3 = inlined_call_operand.vmem [shape: f32[2,1,32], index: 3, kind: input, shape index: {}]   ;;  %s2667_s4 = inlined_call_operand.vmem [shape: bf16[2,32,96], index: 4, kind: input, shape index: {}]   ;;  %s2668_s5 = inlined_call_operand.vmem [shape: f32[2,1,96], index: 5, kind: input, shape index: {}]   ;;  %s2669_s6 = inlined_call_operand.vmem [shape: bf16[2,32,32], index: 6, kind: input, shape index: {}]   ;;  %s2670_s7 = inlined_call_operand.vmem [shape: f32[2,1,32], index: 7, kind: input, shape index: {}]   ;;  %s2671_s8 = inlined_call_operand.vmem [shape: f32[2,1,32], index: 8, kind: input, shape index: {}]   ;;  %s2672_s9 = inlined_call_operand.vmem [shape: f32[2,1,32], index: 9, kind: input, shape index: {}]   ;;  %s2673_s10 = inlined_call_operand.vmem [shape: bf16[2,32,128], index: 10, kind: input, shape index: {}]   ;;  %s2674_s11 = inlined_call_operand.vmem [shape: f32[2,1,128], index: 11, kind: input, shape index: {}]   ;;  %s2675_s12 = inlined_call_operand.vmem [shape: bf16[2,128,32], index: 12, kind: input, shape index: {}]   ;;  %s2676_s13 = inlined_call_operand.vmem [shape: f32[2,1,32], index: 13, kind: input, shape index: {}]   ;;  %s2677_s14 = inlined_call_operand.vmem [shape: f32[16,32], index: 14, kind: output, shape index: {0}, may-alias: {0,14}]   ;;  %s2678_s15 = inlined_call_operand.vmem [shape: bf16[2,16,32], index: 15, kind: output, shape index: {1}]  }
   0x1   :  { %2683 = sst [smem:[#allocation8_spill]] %s2663_s0  ;;  %s2358_s20 = smov 0  }
   0x2   :  { %2684 = sst [smem:[#allocation9_spill]] %s2664_s1  ;;  %s2360_s21 = smov 0  }
   0x3   :  { %2685 = sst [smem:[#allocation10_spill]] %s2665_s2  ;;  %s2362_s22 = smov 0  }
   0x4   :  { %2686 = sst [smem:[#allocation11_spill]] %s2666_s3 }
   0x5   :  { %2687 = sst [smem:[#allocation12_spill]] %s2667_s4 }
   0x6   :  { %2688 = sst [smem:[#allocation13_spill]] %s2669_s6 }
   0x7   :  { %2689 = sst [smem:[#allocation14_spill]] %s2673_s10 }
   0x8   :  { %2690 = sst [smem:[#allocation15_spill]] %s2674_s11 }
   0x9   :  { %2691 = sst [smem:[#allocation16_spill]] %s2677_s14 }
   0xa   :  { %2692 = sst [smem:[#allocation17_spill]] %s2678_s15 }
   0xb LB: > { %2693 = sst [smem:[#allocation2_spill]] %s2243_s18  ;;  %s35_s23 = sadd.s32 1, %s2251_s20  ;;  %s2259_s22 = sphi %s2362_s22, %s26_s22   ;;  %s2255_s21 = sphi %s2360_s21, %s2724_s21   ;;  %s2251_s20 = sphi %s2358_s20, %s2723_s20   ;;  %s2247_s19 = sphi %s2356_s19, %s2722_s19   ;;  %s2243_s18 = sphi %s2354_s18, %s2721_s18  }
   0xc   : > { %2694 = sst [smem:[#allocation3_spill]] %s2251_s20  ;;  %s38_s24 = sadd.s32 1, %s2255_s21 }
   0xd   : > { %2695 = sst [smem:[#allocation4_spill]] %s2255_s21  ;;  %p36_p0 = scmp.ge.s32.totalorder %s35_s23, 2 }
   0xe   : > { %2696 = sst [smem:[#allocation5_spill]] %s2259_s22  ;;  %p1933_p1 = scmp.ge.s32.totalorder %s2259_s22, 1 }
   0xf   : > { %p557_p2 = scmp.lt.s32.totalorder %s2259_s22, 5  ;;  %s2726_s23 = smov (%p36_p0, %s35_s23), 0 }
  0x10   : > { %2697 = sst [smem:[#allocation6_spill]] %s2726_s23  ;;  %s2728_s24 = smov (!%p36_p0, %s38_s24), %s2255_s21 }
  0x11   : > { %p558_p3 = pnand %p1933_p1, %p557_p2  ;;  %p40_p4 = scmp.ge.s32.totalorder %s2728_s24, 2 }
  0x12   : > { %p655_p5 = scmp.lt.s32.totalorder (!%p558_p3), %s2247_s19, 1  ;;  %p659_p6 = scmp.lt.s32.totalorder (!%p558_p3), %s2243_s18, 1 }
  0x13   : > { %s2730_s24 = smov (%p40_p4, %s2728_s24), 0  ;;  %561 = sbr.rel (%p558_p3) target bundleno = 4275 (0x10b3), region = 76 }
  0x14   : > { %2698 = sst [smem:[#allocation7_spill]] %s2730_s24  ;;  %s2699_s0 = sld [smem:[#allocation8_spill]] (!%p558_p3) }
  0x15   : > { %s2702_s4 = sld [smem:[#allocation12_spill]] (!%p558_p3)  ;;  %s2703_s6 = sld [smem:[#allocation13_spill]] (!%p558_p3) }
  0x16   : > { %s2704_s10 = sld [smem:[#allocation14_spill]] (!%p558_p3)  ;;  %s2707_s27 = sld [smem:[#allocation17_spill]] (!%p558_p3) }
  0x17   : > { %s2708_s17 = sld [smem:[#allocation2_spill]] (!%p558_p3) }
  0x1a   : > { %s2732_s19 = smov (!%p655_p5, %s2247_s19), 1 }
  0x1b   : > { %s2388_s25 = scalar_select %p659_p6, %s2243_s18, 1 }
  0x1c   : > { %s1934_s26 = sshll.u32 %s2732_s19, 3 }
  0x1d   : > { %s658_s29 = scalar_lea.vmem %s2699_s0, %s1934_s26  ;;  %s1983_s20 = sshll.u32 %s2388_s25, 4 }
  0x1e   : > { %s2405_s18 = scalar_lea.vmem %s2702_s4, %s1983_s20  ;;  %s2414_s30 = scalar_lea.vmem %s2703_s6, %s1983_s20 }
  0x1f   : > { %s2431_s15 = scalar_lea.vmem %s2704_s10, %s1983_s20  ;;  %s1986_s6 = sshll.u32 %s2388_s25, 6 }
  0x20   : > { %s702_s23 = scalar_lea.vmem %s2676_s13, %s2388_s25  ;;  %s2445_s3 = scalar_lea.vmem %s2675_s12, %s1986_s6 }
  0x21   : > { %s2706_s4 = sld [smem:[#allocation16_spill]]  ;;  %s1944_s20 = sshll.u32 %s2388_s25, 1 }
  0x22   : > { %s712_s14 = sadd.s32 %s1944_s20, %s2732_s19  ;;  %p1946_p7 = scmp.ne.s32.totalorder %s2708_s17, 0 }
  0x23   : > { %s1945_s10 = sshll.u32 %s712_s14, 2  ;;  %v720_v0 = vld [vmem:[%s658_s29] sm:$0xff] (!%p1946_p7)  ;;  %vm721_vm0 = vcmask (!%p1946_p7), 261120  }
  0x24   : > { %s2456_s11 = scalar_lea.vmem %s2707_s27, %s1945_s10  ;;  %719 = sbr.rel (%p1946_p7) target bundleno = 43 (0x2b), region = 80 }
  0x27   : > { %s2450_s2 = scalar_lea.vmem %s2706_s4, %s1934_s26 }
  0x28   : > { %722 = vst.msk [vmem:[%s2450_s2] sm:$0xff] (!%p1946_p7), %vm721_vm0, %v720_v0 }
  0x2b PF: > { %vm726_vm1 = vcmask 261120   ;;  %v2187_v8 = vld [vmem:[%s2405_s18] sm:$0xff]   ;;  %v2261_v9 = vmov 0.0   ;;  %vm2262_vm2 = vmmov 0   ;;  %v2188_v10 = vld [vmem:[%s2405_s18 + $0x8] sm:$0xff]   ;;  %s2709_s10 = sld [smem:[#allocation10_spill]]  ;;  %s2713_s24 = scalar_lea.vmem %s2668_s5, %s2388_s25 }
  0x2c   : > { %2026 = vmatprep.subr.bf16.mxu1 %v2261_v9  ;;  %2030 = vmatprep.mubr.msk.bf16.mxu1 %vm2262_vm2, %v2261_v9  ;;  %s2711_s29 = sld [smem:[#allocation11_spill]]  ;;  %v1949_v21 = vld [vmem:[%s2713_s24] ss:$0 sm:$0xff]  ;;  %s2263_s1 = smov 64   ;;  %vm831_vm3 = vcmask 64512   ;;  %vm897_vm4 = vcmask 1043456  }
  0x2d   : > { %2027 = vmatpush3.bf16.msra.mxu1 %v2187_v8  ;;  %2052 = vmatprep.subr.bf16.mxu0 %v2261_v9  ;;  %s2264_s22 = smov 96   ;;  %s2714_s0 = sld [smem:[#allocation9_spill]]  ;;  %vm1696_vm5 = vcmask 257024  }
  0x2e   : > { %2028 = vmatprep.subr.bf16.mxu1 %v2261_v9  ;;  %2054 = vmatprep.mubr.msk.bf16.mxu0 %vm2262_vm2, %v2261_v9  ;;  %s2265_s28 = smov 88   ;;  %s2266_s17 = smov 120  }
  0x2f   : > { %v2461_v1 = vld [vmem:[%s2450_s2] sm:$0xff]  ;;  %s2267_s4 = smov 56   ;;  %s2268_s6 = smov 80  }
  0x30   : > { %v727_v2 = vsel %vm726_vm1, %v2461_v1, 0.0  ;;  %s2271_s19 = smov 72   ;;  %s2272_s26 = smov 104  }
  0x31   : > { %728 = vadd.xlane.f32.xlu0 %v727_v2  ;;  %2029 = vmatpush3.bf16.msra.mxu1 %v2188_v10  ;;  %s2710_s18 = scalar_lea.vmem %s2709_s10, %s2388_s25  ;;  %s2269_s10 = smov 112  }
  0x32   : > { %2034 = vmatprep.subr.bf16.mxu1 %v2261_v9  ;;  %v1947_v15 = vld [vmem:[%s2710_s18] ss:$0 sm:$0xff]  ;;  %s2712_s27 = scalar_lea.vmem %s2711_s29, %s2388_s25  ;;  %s2270_s18 = smov 48  }
  0x33   : > { %v1948_v17 = vld [vmem:[%s2712_s27] ss:$0 sm:$0xff]  ;;  %s2273_s29 = smov 40   ;;  %s2715_s16 = scalar_lea.vmem %s2670_s7, %s2388_s25 }
  0x34   : > { %v2510_v33 = vld [vmem:[%s2714_s0] sm:$0xff]  ;;  %s2717_s20 = scalar_lea.vmem %s2672_s9, %s2388_s25 }
  0xbe   : > { %v729_v3 = vpop.xlane.xlu0 %728 }
  0xbf   : > { %v731_v4 = vmul.f32 0.03125, %v729_v3 }
  0xc1   : > { %v732_v5 = vsub.f32 %v2461_v1, %v731_v4 }
  0xc3   : > { %v733_v6 = vmul.f32 %v732_v5, %v732_v5 }
  0xc5   : > { %v734_v7 = vsel %vm726_vm1, %v733_v6, 0.0 }
  0xc6   : > { %735 = vadd.xlane.f32.xlu0 %v734_v7  ;;  %v825_v7 = vld [vmem:[%s2414_s30 + $0x4] sm:$0xf] }
  0xc7   : > { %v1059_v8 = vsel %vm897_vm4, %v825_v7, 0 }
 0x153   : > { %v736_v11 = vpop.xlane.xlu0 %735 }
 0x154   : > { %v737_v12 = vmul.f32 0.03125, %v736_v11 }
 0x156   : > { %v738_v13 = vadd.f32 1e-05, %v737_v12  ;;  %v824_v12 = vld [vmem:[%s2414_s30] sm:$0xf] }
 0x158   : > { %2199 = vrsqrt.f32 %v738_v13 }
 0x162   : > { %v2200_v14 = vpop.eup %2199 }
 0x163   : > { %v740_v16 = vmul.f32 %v2200_v14, %v732_v5 }
 0x165   : > { %v747_v18 = vmul.f32 %v1947_v15, %v740_v16  ;;  %v1105_v15 = vsel %vm897_vm4, %v824_v12, 0 }
 0x167   : > { %v754_v19 = vadd.f32 %v1948_v17, %v747_v18 }
 0x169   : > { %v755_v20 = vpack.c.bf16 %v754_v19, %v754_v19 }
 0x16b   : > { %2031 = vmatmul.mubr.msk.bf16.vlgmr.msra.gmra.mrb[0].mxu1 %vm726_vm1, %v755_v20 }
 0x16c   : > { %2036 = vmatprep.mubr.msk.bf16.mxu1 %vm2262_vm2, %v2261_v9 }
 0x23e   : > { %v816_v22 = vpop.f32.mrb[0].mxu1 }
 0x23f   : > { %v817_v23 = vadd.f32 %v1949_v21, %v816_v22  ;;  %v2032_v24 = vpop.f32.mrb[1].mxu1 }
 0x240   : > { %v819_v25 = vpop.f32.mrb[2].mxu1 }
 0x241   : > { %v2495_v26 = vpack.c.bf16 %v817_v23, %v817_v23  ;;  %v2033_v27 = vpop.f32.mrb[3].mxu1 }
 0x243   : > { %892 = vrot.lane.b32.xlu0 %v2495_v26, %s2263_s1  ;;  %829 = vrot.lane.b32.xlu1 %v2495_v26, %s2264_s22  ;;  %s2716_s1 = scalar_lea.vmem %s2671_s8, %s2388_s25 }
 0x2b5   : > { %v830_v28 = vpop.permute.xlu1 %829  ;;  %v893_v30 = vpop.permute.xlu0 %892 }
 0x2b6   : > { %v836_v29 = vsel %vm831_vm3, %v830_v28, 0  ;;  %v899_v31 = vsel %vm897_vm4, %v893_v30, 0 }
 0x2b7   : > { %2035 = vmatpush3.bf16.xpose.msra.mxu1 %v836_v29 }
 0x2b8   : > { %2040 = vmatprep.subr.bf16.mxu1 %v2261_v9 }
 0x2be   : > { %2037 = vmatmul.mubr.msk.bf16.vlgmr.msra.gmra.mrb[4].mxu1 %vm831_vm3, %v2495_v26 }
 0x2bf   : > { %2041 = vmatpush3.bf16.msra.mxu1 %v899_v31  ;;  %2042 = vmatprep.mubr.msk.bf16.mxu1 %vm2262_vm2, %v2261_v9 }
 0x2c0   : > { %2046 = vmatprep.subr.bf16.mxu1 %v2261_v9 }
 0x391   : > { %v872_v32 = vpop.f32.mrb[4].mxu1 }
 0x392   : > { %v878_v34 = vmul.f32 0.35355338, %v872_v32  ;;  %v2038_v35 = vpop.f32.mrb[5].mxu1 }
 0x393   : > { %v875_v36 = vpop.f32.mrb[6].mxu1 }
 0x394   : > { %v2039_v37 = vpop.f32.mrb[7].mxu1  ;;  %v879_v38 = vadd.f32 %v878_v34, %v2510_v33 }
 0x396   : > { %v880_v39 = vsel %vm831_vm3, %v879_v38, -inf }
 0x397   : > { %881 = vmax.xlane.f32.xlu1 %v880_v39 }
 0x424   : > { %v882_v40 = vpop.xlane.xlu1 %881 }
 0x425   : > { %v883_v41 = vsub.f32 %v879_v38, %v882_v40 }
 0x427   : > { %v884_v42 = vmul.f32 1.442695, %v883_v41 }
 0x429   : > { %2201 = vpow2.f32 %v884_v42 }
 0x433   : > { %v2202_v43 = vpop.eup %2201 }
 0x434   : > { %v886_v44 = vsel %vm831_vm3, %v2202_v43, 0.0 }
 0x435   : > { %887 = vadd.xlane.f32.xlu0 %v886_v44 }
 0x44b   : > { %944 = vrot.lane.b32.xlu0 %v2495_v26, %s2265_s28  ;;  %s2718_s28 = sld [smem:[#allocation15_spill]] }
 0x44f   : > { %942 = vrot.lane.b32.xlu0 %v2495_v26, %s2266_s17 }
 0x451   : > { %s2719_s17 = scalar_lea.vmem %s2718_s28, %s2388_s25 }
 0x4c2   : > { %v888_v45 = vpop.xlane.xlu0 %887 }
 0x4c3   : > { %2203 = vrcp.f32 %v888_v45 }
 0x4c6   : > { %v945_v48 = vpop.permute.xlu0 %944 }
 0x4c7   : > { %v950_v50 = vsel %vm831_vm3, %v945_v48, 0 }
 0x4ca   : > { %v943_v51 = vpop.permute.xlu0 %942 }
 0x4cd   : > { %v2204_v46 = vpop.eup %2203 }
 0x4ce   : > { %v890_v47 = vmul.f32 %v2204_v46, %v2202_v43 }
 0x4d0   : > { %v891_v49 = vpack.c.bf16 %v890_v47, %v890_v47 }
 0x4d2   : > { %2043 = vmatmul.mubr.msk.bf16.vlgmr.msra.gmra.mrb[8].mxu1 %vm831_vm3, %v891_v49 }
 0x4d3   : > { %2047 = vmatpush3.bf16.xpose.msra.mxu1 %v950_v50  ;;  %2048 = vmatprep.mubr.msk.bf16.mxu1 %vm2262_vm2, %v2261_v9 }
 0x4d4   : > { %2058 = vmatprep.subr.bf16.mxu1 %v2261_v9 }
 0x4da   : > { %2049 = vmatmul.mubr.msk.bf16.vlgmr.msra.gmra.mrb[12].mxu1 %vm831_vm3, %v943_v51 }
 0x4db   : > { %2060 = vmatprep.mubr.msk.bf16.mxu1 %vm2262_vm2, %v2261_v9  ;;  %2059 = vmatpush3.bf16.msra.mxu1 %v1059_v8 }
 0x4dc   : > { %2070 = vmatprep.subr.bf16.mxu1 %v2261_v9 }
 0x5a5   : > { %v935_v52 = vpop.f32.mrb[8].mxu1 }
 0x5a6   : > { %v2044_v53 = vpop.f32.mrb[9].mxu1  ;;  %v941_v17 = vpack.c.bf16 %v935_v52, %v935_v52 }
 0x5a7   : > { %v938_v54 = vpop.f32.mrb[10].mxu1 }
 0x5a8   : > { %v2045_v55 = vpop.f32.mrb[11].mxu1 }
 0x5ad   : > { %v986_v56 = vpop.f32.mrb[12].mxu1 }
 0x5ae   : > { %v992_v57 = vmul.f32 0.35355338, %v986_v56  ;;  %v2050_v58 = vpop.f32.mrb[13].mxu1 }
 0x5af   : > { %v989_v59 = vpop.f32.mrb[14].mxu1 }
 0x5b0   : > { %v2051_v60 = vpop.f32.mrb[15].mxu1  ;;  %v993_v61 = vadd.f32 %v992_v57, %v2510_v33  ;;  %v826_v57 = vld [vmem:[%s2414_s30 + $0x8] sm:$0xf] }
 0x5b1   : > { %v1264_v58 = vsel %vm897_vm4, %v826_v57, 0 }
 0x5b2   : > { %v994_v62 = vsel %vm831_vm3, %v993_v61, -inf }
 0x5b3   : > { %995 = vmax.xlane.f32.xlu1 %v994_v62 }
 0x5c4   : > { %1006 = vrot.lane.b32.xlu1 %v2495_v26, %s2267_s4 }
 0x5c8   : > { %1149 = vrot.lane.b32.xlu1 %v2495_v26, %s2268_s6 }
 0x5cc   : > { %1147 = vrot.lane.b32.xlu1 %v2495_v26, %s2269_s10 }
 0x640   : > { %v996_v63 = vpop.xlane.xlu1 %995 }
 0x641   : > { %v997_v0 = vsub.f32 %v993_v61, %v996_v63 }
 0x643   : > { %v998_v2 = vmul.f32 1.442695, %v997_v0 }
 0x644   : > { %v1007_v3 = vpop.permute.xlu1 %1006 }
 0x645   : > { %2205 = vpow2.f32 %v998_v2  ;;  %v1012_v4 = vsel %vm897_vm4, %v1007_v3, 0 }
 0x646   : > { %2053 = vmatpush3.bf16.msra.mxu0 %v1012_v4 }
 0x647   : > { %2064 = vmatprep.subr.bf16.mxu0 %v2261_v9 }
 0x648   : > { %v1150_v19 = vpop.permute.xlu1 %1149 }
 0x649   : > { %v1155_v24 = vsel %vm831_vm3, %v1150_v19, 0 }
 0x64c   : > { %v1148_v29 = vpop.permute.xlu1 %1147 }
 0x64f   : > { %v2206_v5 = vpop.eup %2205 }
 0x650   : > { %v1000_v6 = vsel %vm831_vm3, %v2206_v5, 0.0 }
 0x651   : > { %1001 = vadd.xlane.f32.xlu0 %v1000_v6 }
 0x667   : > { %1211 = vrot.lane.b32.xlu0 %v2495_v26, %s2270_s18 }
 0x6de   : > { %v1002_v10 = vpop.xlane.xlu0 %1001 }
 0x6df   : > { %2207 = vrcp.f32 %v1002_v10 }
 0x6e2   : > { %v1212_v16 = vpop.permute.xlu0 %1211 }
 0x6e3   : > { %v1217_v18 = vsel %vm897_vm4, %v1212_v16, 0 }
 0x6e9   : > { %v2208_v11 = vpop.eup %2207 }
 0x6ea   : > { %v1004_v13 = vmul.f32 %v2208_v11, %v2206_v5 }
 0x6ec   : > { %v1005_v14 = vpack.c.bf16 %v1004_v13, %v1004_v13 }
 0x6ee   : > { %2055 = vmatmul.mubr.msk.bf16.vlgmr.msra.gmra.mrb[0].mxu0 %vm831_vm3, %v1005_v14 }
 0x6ef   : > { %2065 = vmatpush3.bf16.msra.mxu0 %v1105_v15  ;;  %2066 = vmatprep.mubr.msk.bf16.mxu0 %vm2262_vm2, %v2261_v9  ;;  %v827_v15 = vld [vmem:[%s2414_s30 + $0xc] sm:$0xf] }
 0x6f0   : > { %2076 = vmatprep.subr.bf16.mxu0 %v2261_v9  ;;  %v1424_v16 = vsel %vm897_vm4, %v827_v15, 0 }
 0x6f6   : > { %2067 = vmatmul.mubr.msk.bf16.vlgmr.msra.gmra.mrb[4].mxu0 %vm831_vm3, %v941_v17 }
 0x6f7   : > { %2077 = vmatpush3.bf16.msra.mxu0 %v1217_v18  ;;  %2078 = vmatprep.mubr.msk.bf16.mxu0 %vm2262_vm2, %v2261_v9 }
 0x6f8   : > { %2088 = vmatprep.subr.bf16.mxu0 %v2261_v9 }
 0x7c1   : > { %v1048_v20 = vpop.f32.mrb[0].mxu0 }
 0x7c2   : > { %v1054_v21 = vpack.c.bf16 %v1048_v20, %v1048_v20  ;;  %v2056_v22 = vpop.f32.mrb[1].mxu0 }
 0x7c3   : > { %v1051_v23 = vpop.f32.mrb[2].mxu0 }
 0x7c4   : > { %v2057_v25 = vpop.f32.mrb[3].mxu0  ;;  %2061 = vmatmul.mubr.msk.bf16.vlgmr.msra.gmra.mrb[16].mxu1 %vm831_vm3, %v1054_v21 }
 0x7c5   : > { %2071 = vmatpush3.bf16.xpose.msra.mxu1 %v1155_v24  ;;  %2072 = vmatprep.mubr.msk.bf16.mxu1 %vm2262_vm2, %v2261_v9 }
 0x7c6   : > { %2082 = vmatprep.subr.bf16.mxu1 %v2261_v9 }
 0x7c9   : > { %v1141_v27 = vpop.f32.mrb[4].mxu0 }
 0x7ca   : > { %v2068_v28 = vpop.f32.mrb[5].mxu0 }
 0x7cb   : > { %v1144_v30 = vpop.f32.mrb[6].mxu0 }
 0x7cc   : > { %v2069_v31 = vpop.f32.mrb[7].mxu0  ;;  %2073 = vmatmul.mubr.msk.bf16.vlgmr.msra.gmra.mrb[20].mxu1 %vm831_vm3, %v1148_v29 }
 0x7cd   : > { %2084 = vmatprep.mubr.msk.bf16.mxu1 %vm2262_vm2, %v2261_v9  ;;  %2083 = vmatpush3.bf16.msra.mxu1 %v1264_v58  ;;  %v2192_v58 = vld [vmem:[%s2445_s3 + $0x8] sm:$0xff]  }
 0x7ce   : > { %2094 = vmatprep.subr.bf16.mxu1 %v2261_v9 }
 0x897   : > { %v1095_v32 = vpop.f32.mrb[16].mxu1 }
 0x898   : > { %v2556_v34 = vadd.f32 %v1141_v27, %v1095_v32  ;;  %v2062_v35 = vpop.f32.mrb[17].mxu1 }
 0x899   : > { %v1098_v36 = vpop.f32.mrb[18].mxu1  ;;  %v1965_v35 = vld [vmem:[%s2715_s16] ss:$0 sm:$0xff] }
 0x89a   : > { %v2063_v37 = vpop.f32.mrb[19].mxu1 }
 0x89f   : > { %v1191_v38 = vpop.f32.mrb[20].mxu1 }
 0x8a0   : > { %v1197_v39 = vmul.f32 0.35355338, %v1191_v38  ;;  %v2074_v40 = vpop.f32.mrb[21].mxu1 }
 0x8a1   : > { %v1194_v41 = vpop.f32.mrb[22].mxu1 }
 0x8a2   : > { %v2075_v42 = vpop.f32.mrb[23].mxu1  ;;  %v1198_v43 = vadd.f32 %v1197_v39, %v2510_v33 }
 0x8a4   : > { %v1199_v44 = vsel %vm831_vm3, %v1198_v43, -inf }
 0x8a5   : > { %1200 = vmax.xlane.f32.xlu1 %v1199_v44 }
 0x932   : > { %v1201_v45 = vpop.xlane.xlu1 %1200 }
 0x933   : > { %v1202_v46 = vsub.f32 %v1198_v43, %v1201_v45 }
 0x935   : > { %v1203_v47 = vmul.f32 1.442695, %v1202_v46  ;;  %v2189_v46 = vld [vmem:[%s2431_s15] sm:$0xff]  }
 0x937   : > { %2209 = vpow2.f32 %v1203_v47  ;;  %v2191_v47 = vld [vmem:[%s2445_s3] sm:$0xff]  }
 0x941   : > { %v2210_v48 = vpop.eup %2209 }
 0x942   : > { %v1205_v49 = vsel %vm831_vm3, %v2210_v48, 0.0 }
 0x943   : > { %1206 = vadd.xlane.f32.xlu0 %v1205_v49 }
 0x959   : > { %1309 = vrot.lane.b32.xlu0 %v2495_v26, %s2271_s19 }
 0x95d   : > { %1307 = vrot.lane.b32.xlu0 %v2495_v26, %s2272_s26 }
 0x9d0   : > { %v1207_v50 = vpop.xlane.xlu0 %1206 }
 0x9d1   : > { %2211 = vrcp.f32 %v1207_v50 }
 0x9d4   : > { %v1310_v53 = vpop.permute.xlu0 %1309 }
 0x9d5   : > { %v1315_v55 = vsel %vm831_vm3, %v1310_v53, 0 }
 0x9d8   : > { %v1308_v56 = vpop.permute.xlu0 %1307 }
 0x9db   : > { %v2212_v51 = vpop.eup %2211 }
 0x9dc   : > { %v1209_v52 = vmul.f32 %v2212_v51, %v2210_v48 }
 0x9de   : > { %v1210_v54 = vpack.c.bf16 %v1209_v52, %v1209_v52  ;;  %v1966_v52 = vld [vmem:[%s2716_s1] ss:$0 sm:$0xff] }
 0x9e0   : > { %2079 = vmatmul.mubr.msk.bf16.vlgmr.msra.gmra.mrb[8].mxu0 %vm831_vm3, %v1210_v54  ;;  %v1967_v54 = vld [vmem:[%s2717_s20] ss:$0 sm:$0xff] }
 0x9e1   : > { %2089 = vmatpush3.bf16.xpose.msra.mxu0 %v1315_v55  ;;  %2090 = vmatprep.mubr.msk.bf16.mxu0 %vm2262_vm2, %v2261_v9 }
 0x9e2   : > { %2100 = vmatprep.subr.bf16.mxu0 %v2261_v9 }
 0x9e8   : > { %2091 = vmatmul.mubr.msk.bf16.vlgmr.msra.gmra.mrb[12].mxu0 %vm831_vm3, %v1308_v56 }
 0x9e9   : > { %2102 = vmatprep.mubr.msk.bf16.mxu0 %vm2262_vm2, %v2261_v9  ;;  %2101 = vmatpush3.bf16.msra.mxu0 %v1424_v16 }
 0x9ea   : > { %2114 = vmatprep.subr.bf16.mxu0 %v2261_v9 }
 0xab3   : > { %v1253_v59 = vpop.f32.mrb[8].mxu0 }
 0xab4   : > { %v1259_v60 = vpack.c.bf16 %v1253_v59, %v1253_v59  ;;  %v2080_v61 = vpop.f32.mrb[9].mxu0  ;;  %v2193_v59 = vld [vmem:[%s2445_s3 + $0x10] sm:$0xff]  }
 0xab5   : > { %v1256_v62 = vpop.f32.mrb[10].mxu0  ;;  %v2195_v61 = vld [vmem:[%s2445_s3 + $0x20] sm:$0xff]  }
 0xab6   : > { %v2081_v63 = vpop.f32.mrb[11].mxu0  ;;  %2085 = vmatmul.mubr.msk.bf16.vlgmr.msra.gmra.mrb[24].mxu1 %vm831_vm3, %v1259_v60  ;;  %v2194_v60 = vld [vmem:[%s2445_s3 + $0x18] sm:$0xff]   ;;  %v2196_v62 = vld [vmem:[%s2445_s3 + $0x28] sm:$0xff]  }
 0xab7   : > { %2096 = vmatprep.mubr.msk.bf16.mxu1 %vm2262_vm2, %v2261_v9  ;;  %v2197_v63 = vld [vmem:[%s2445_s3 + $0x30] sm:$0xff]  }
 0xabb   : > { %v1351_v0 = vpop.f32.mrb[12].mxu0 }
 0xabc   : > { %v1357_v2 = vmul.f32 0.35355338, %v1351_v0  ;;  %v2092_v3 = vpop.f32.mrb[13].mxu0  ;;  %v2198_v0 = vld [vmem:[%s2445_s3 + $0x38] sm:$0xff]  }
 0xabd   : > { %v1354_v4 = vpop.f32.mrb[14].mxu0 }
 0xabe   : > { %v2093_v5 = vpop.f32.mrb[15].mxu0  ;;  %v1358_v6 = vadd.f32 %v1357_v2, %v2510_v33  ;;  %v1968_v2 = vld [vmem:[%s2719_s17] ss:$0 sm:$0xff] }
 0xac0   : > { %v1359_v7 = vsel %vm831_vm3, %v1358_v6, -inf }
 0xac1   : > { %1360 = vmax.xlane.f32.xlu1 %v1359_v7 }
 0xad2   : > { %1371 = vrot.lane.b32.xlu1 %v2495_v26, %s2273_s29 }
 0xb4e   : > { %v1361_v8 = vpop.xlane.xlu1 %1360 }
 0xb4f   : > { %v1362_v10 = vsub.f32 %v1358_v6, %v1361_v8 }
 0xb51   : > { %v1363_v11 = vmul.f32 1.442695, %v1362_v10 }
 0xb52   : > { %v1372_v12 = vpop.permute.xlu1 %1371 }
 0xb53   : > { %2213 = vpow2.f32 %v1363_v11  ;;  %v1377_v13 = vsel %vm897_vm4, %v1372_v12, 0 }
 0xb54   : > { %2095 = vmatpush3.bf16.msra.mxu1 %v1377_v13 }
 0xb55   : > { %2106 = vmatprep.subr.bf16.mxu1 %v2261_v9 }
 0xb5d   : > { %v2214_v14 = vpop.eup %2213 }
 0xb5e   : > { %v1365_v33 = vsel %vm831_vm3, %v2214_v14, 0.0 }
 0xb5f   : > { %1366 = vadd.xlane.f32.xlu0 %v1365_v33 }
 0xb89   : > { %v1300_v26 = vpop.f32.mrb[24].mxu1 }
 0xb8a   : > { %v1306_v17 = vadd.f32 %v1300_v26, %v2556_v34  ;;  %v2086_v18 = vpop.f32.mrb[25].mxu1  ;;  %v1972_v26 = vld [vmem:[%s702_s23] ss:$0 sm:$0xff] }
 0xb8b   : > { %v1303_v19 = vpop.f32.mrb[26].mxu1 }
 0xb8c   : > { %v2087_v20 = vpop.f32.mrb[27].mxu1 }
 0xbec   : > { %v1367_v21 = vpop.xlane.xlu0 %1366 }
 0xbed   : > { %2215 = vrcp.f32 %v1367_v21 }
 0xbf7   : > { %v2216_v22 = vpop.eup %2215 }
 0xbf8   : > { %v1369_v23 = vmul.f32 %v2216_v22, %v2214_v14 }
 0xbfa   : > { %v1370_v24 = vpack.c.bf16 %v1369_v23, %v1369_v23 }
 0xbfc   : > { %2097 = vmatmul.mubr.msk.bf16.vlgmr.msra.gmra.mrb[28].mxu1 %vm831_vm3, %v1370_v24 }
 0xbfd   : > { %2110 = vmatprep.mubr.msk.bf16.mxu1 %vm2262_vm2, %v2261_v9  ;;  %2107 = vmatpush3.bf16.msra.mxu1 %v2189_v46 }
 0xbfe   : > { %2108 = vmatprep.subr.bf16.mxu1 %v2261_v9 }
 0xccf   : > { %v1413_v25 = vpop.f32.mrb[28].mxu1 }
 0xcd0   : > { %v1419_v27 = vpack.c.bf16 %v1413_v25, %v1413_v25  ;;  %v2098_v28 = vpop.f32.mrb[29].mxu1 }
 0xcd1   : > { %v1416_v29 = vpop.f32.mrb[30].mxu1 }
 0xcd2   : > { %v2099_v30 = vpop.f32.mrb[31].mxu1  ;;  %2103 = vmatmul.mubr.msk.bf16.vlgmr.msra.gmra.mrb[16].mxu0 %vm831_vm3, %v1419_v27 }
 0xcd3   : > { %2130 = vmatprep.mubr.msk.bf16.mxu0 %vm2262_vm2, %v2261_v9  ;;  %2115 = vmatpush3.bf16.msra.mxu0 %v2191_v47 }
 0xcd4   : > { %2116 = vmatprep.subr.bf16.mxu0 %v2261_v9 }
 0xcd7   : > { %2117 = vmatpush3.bf16.msra.mxu0 %v2192_v58 }
 0xcd8   : > { %2118 = vmatprep.subr.bf16.mxu0 %v2261_v9 }
 0xcdb   : > { %2119 = vmatpush3.bf16.msra.mxu0 %v2193_v59 }
 0xcdc   : > { %2120 = vmatprep.subr.bf16.mxu0 %v2261_v9 }
 0xcdf   : > { %2121 = vmatpush3.bf16.msra.mxu0 %v2194_v60 }
 0xce0   : > { %2122 = vmatprep.subr.bf16.mxu0 %v2261_v9 }
 0xce3   : > { %2123 = vmatpush3.bf16.msra.mxu0 %v2195_v61 }
 0xce4   : > { %2124 = vmatprep.subr.bf16.mxu0 %v2261_v9 }
 0xce7   : > { %2125 = vmatpush3.bf16.msra.mxu0 %v2196_v62 }
 0xce8   : > { %2126 = vmatprep.subr.bf16.mxu0 %v2261_v9 }
 0xceb   : > { %2127 = vmatpush3.bf16.msra.mxu0 %v2197_v63 }
 0xcec   : > { %2128 = vmatprep.subr.bf16.mxu0 %v2261_v9 }
 0xcef   : > { %2129 = vmatpush3.bf16.msra.mxu0 %v2198_v0 }
 0xda5   : > { %v1460_v31 = vpop.f32.mrb[16].mxu0 }
 0xda6   : > { %v1466_v32 = vadd.f32 %v1460_v31, %v1306_v17  ;;  %v2104_v34 = vpop.f32.mrb[17].mxu0 }
 0xda7   : > { %v1463_v36 = vpop.f32.mrb[18].mxu0 }
 0xda8   : > { %v1467_v37 = vadd.f32 %v1466_v32, %v2461_v1  ;;  %v2105_v38 = vpop.f32.mrb[19].mxu0  ;;  %v2190_v1 = vld [vmem:[%s2431_s15 + $0x8] sm:$0xff]  }
 0xda9   : > { %2109 = vmatpush3.bf16.msra.mxu1 %v2190_v1 }
 0xdaa   : > { %v2599_v39 = vadd.f32 %v1965_v35, %v1467_v37 }
 0xdac   : > { %v1478_v40 = vsel %vm726_vm1, %v2599_v39, 0.0 }
 0xdad   : > { %1479 = vadd.xlane.f32.xlu1 %v1478_v40 }
 0xe3a   : > { %v1480_v41 = vpop.xlane.xlu1 %1479 }
 0xe3b   : > { %v1481_v42 = vmul.f32 0.03125, %v1480_v41 }
 0xe3d   : > { %v1482_v43 = vsub.f32 %v2599_v39, %v1481_v42 }
 0xe3f   : > { %v1483_v44 = vmul.f32 %v1482_v43, %v1482_v43 }
 0xe41   : > { %v1484_v45 = vsel %vm726_vm1, %v1483_v44, 0.0 }
 0xe42   : > { %1485 = vadd.xlane.f32.xlu0 %v1484_v45 }
 0xecf   : > { %v1486_v48 = vpop.xlane.xlu0 %1485 }
 0xed0   : > { %v1487_v49 = vmul.f32 0.03125, %v1486_v48 }
 0xed2   : > { %v1488_v50 = vadd.f32 1e-05, %v1487_v49 }
 0xed4   : > { %2217 = vrsqrt.f32 %v1488_v50 }
 0xede   : > { %v2218_v51 = vpop.eup %2217 }
 0xedf   : > { %v1490_v53 = vmul.f32 %v2218_v51, %v1482_v43 }
 0xee1   : > { %v1497_v55 = vmul.f32 %v1966_v52, %v1490_v53 }
 0xee3   : > { %v1504_v56 = vadd.f32 %v1967_v54, %v1497_v55 }
 0xee5   : > { %v1505_v57 = vpack.c.bf16 %v1504_v56, %v1504_v56 }
 0xee7   : > { %2111 = vmatmul.mubr.msk.bf16.vlgmr.msra.gmra.mrb[32].mxu1 %vm726_vm1, %v1505_v57 }
 0xfba   : > { %v1566_v3 = vpop.f32.mrb[32].mxu1 }
 0xfbb   : > { %v1567_v4 = vadd.f32 %v1968_v2, %v1566_v3  ;;  %v2112_v5 = vpop.f32.mrb[33].mxu1 }
 0xfbc   : > { %v1569_v6 = vpop.f32.mrb[34].mxu1 }
 0xfbd   : > { %v1573_v7 = vmul.f32 0.044715, %v1567_v4  ;;  %v2113_v8 = vpop.f32.mrb[35].mxu1  ;;  %v1572_v14 = vmul.f32 0.5, %v1567_v4 }
 0xfbf   : > { %v1574_v10 = vmul.f32 %v1573_v7, %v1567_v4 }
 0xfc1   : > { %v1575_v11 = vmul.f32 %v1574_v10, %v1567_v4 }
 0xfc3   : > { %v1576_v12 = vadd.f32 %v1575_v11, %v1567_v4 }
 0xfc5   : > { %v1577_v13 = vmul.f32 0.7978846, %v1576_v12 }
 0xfc7   : > { %2219 = vtanh.f32 %v1577_v13 }
 0xfd1   : > { %v2220_v9 = vpop.eup %2219 }
 0xfd2   : > { %v1579_v33 = vadd.f32 1.0, %v2220_v9 }
 0xfd4   : > { %v1580_v15 = vmul.f32 %v1579_v33, %v1572_v14 }
 0xfd6   : > { %v1581_v16 = vpack.c.bf16 %v1580_v15, %v1580_v15 }
 0xfd8   : > { %2131 = vmatmul.mubr.bf16.vlgmr.msra.gmra.mrb[20].mxu0 %v1581_v16 }
0x10ab   : > { %v1687_v17 = vpop.f32.mrb[20].mxu0 }
0x10ac   : > { %v1688_v18 = vadd.f32 %v1972_v26, %v1687_v17  ;;  %v2132_v19 = vpop.f32.mrb[21].mxu0 }
0x10ad   : > { %v1690_v20 = vpop.f32.mrb[22].mxu0 }
0x10ae   : > { %v1693_v21 = vadd.f32 %v1688_v18, %v2599_v39  ;;  %v2133_v22 = vpop.f32.mrb[23].mxu0 }
0x10b0   : > { %1694 = vst.msk [vmem:[%s2450_s2] sm:$0xff] %vm726_vm1, %v1693_v21  ;;  %v1695_v23 = vpack.c.bf16 %v1693_v21, %v1693_v21 }
0x10b2   : > { %1697 = vst.msk [vmem:[%s2456_s11] sm:$0xf] %vm1696_vm5, %v1695_v23 }
0x10b3 PF: > { %s2720_s6 = sld [smem:[#allocation5_spill]]  ;;  %s2721_s18 = sld [smem:[#allocation3_spill]] }
0x10b4   : > { %s2722_s19 = sld [smem:[#allocation4_spill]]  ;;  %s2723_s20 = sld [smem:[#allocation6_spill]] }
0x10b5   : > { %s2724_s21 = sld [smem:[#allocation7_spill]] }
0x10b9   : > { %s26_s22 = sadd.s32 1, %s2720_s6  }
0x10ba   : > { %p23_p8 = scmp.ge.s32.totalorder %s26_s22, 6  }
0x10bc   :  { %25 = sbr.rel (!%p23_p8) target bundleno = 11 (0xb), region = 158 }

</bundles_post_ra>
